<compile_context>
chip_gen: v7x
topology: tpu7x:2x2x1
jax: 0.10.0
libtpu: 0.0.40
codegen_flags: <defaults>
</compile_context>

<pallas_src>
import functools

import numpy as np
import jax
import jax.numpy as jnp
from jax import lax
from jax.experimental import pallas as pl
from jax.experimental.pallas import tpu as pltpu


# ---------------------------------------------------------------------------
# Kernel 1: conv1 as fused im2col-GEMM:  relu(p1 @ w1 + b1)
#   - the /255 input scaling is folded into w1 at param-prep time
#   - bf16 operands, f32 accumulate, bf16 output (halves inter-kernel bytes)
# ---------------------------------------------------------------------------
def _gemm_bias_relu_kernel(p_ref, w_ref, b_ref, o_ref):
    acc = jnp.dot(p_ref[...], w_ref[...], preferred_element_type=jnp.float32)
    acc = jnp.maximum(acc + b_ref[...], 0.0)
    o_ref[...] = acc.astype(o_ref.dtype)


def conv1_gemm(p1, w1, b1):
    M, K = p1.shape
    _, N = w1.shape
    return pl.pallas_call(
        _gemm_bias_relu_kernel,
        out_shape=jax.ShapeDtypeStruct((M, N), jnp.bfloat16),
        grid=(1,),
        in_specs=[
            pl.BlockSpec((M, K), lambda i: (0, 0)),
            pl.BlockSpec((K, N), lambda i: (0, 0)),
            pl.BlockSpec((1, N), lambda i: (0, 0)),
        ],
        out_specs=pl.BlockSpec((M, N), lambda i: (0, 0)),
        compiler_params=pltpu.CompilerParams(dimension_semantics=("arbitrary",)),
    )(p1, w1, b1.reshape(1, N))


# ---------------------------------------------------------------------------
# Kernel 2: conv2 + fc + critic/Categorical heads + deterministic head, fused.
#   - conv2 is one (162,256)x(256,32) GEMM; its output stays in VMEM scratch.
#   - the Linear(2592,256) is computed as sum_p h2[p,:,:] @ wfc3[p] over the 81
#     spatial positions (fori_loop with dynamic ref indexing) -> no in-kernel
#     reshape of the lane dimension is required.
#   - both heads are one (256, 1+n_act) matmul; value/logits are sliced from it.
#   - Categorical mode() and log_prob(mode) computed in-kernel.
# ---------------------------------------------------------------------------
def _tail_kernel(p2_ref, w2_ref, b2_ref, wfc_ref, bfc_ref, wh_ref, bh_ref,
                 val_ref, logits_ref, act_ref, alp_ref,
                 h2_ref, *, batch, n_pos, n_act):
    # conv2 (im2col GEMM) + bias + ReLU; keep result resident in VMEM scratch.
    h2 = jnp.dot(p2_ref[...], w2_ref[...], preferred_element_type=jnp.float32)
    h2_ref[...] = jnp.maximum(h2 + b2_ref[...], 0.0)       # (n_pos*batch, 32)

    hidden = wfc_ref.shape[-1]

    # fc: x[b,n] = relu( sum_p sum_c h2[p,b,c] * wfc3[p,c,n] + bfc[n] )
    def body(p, acc):
        row = pl.multiple_of(p * batch, batch)
        hp = h2_ref[pl.ds(row, batch), :].astype(jnp.bfloat16)    # (batch, 32)
        return acc + jnp.dot(hp, wfc_ref[p],
                             preferred_element_type=jnp.float32)

    x = lax.fori_loop(0, n_pos, body, jnp.zeros((batch, hidden), jnp.float32))
    x = jnp.maximum(x + bfc_ref[...], 0.0)                         # (batch, 256)

    # critic (256->1) and Categorical linear (256->n_act) as one matmul.
    y = jnp.dot(x.astype(jnp.bfloat16), wh_ref[...],
                preferred_element_type=jnp.float32) + bh_ref[...]  # (batch, 1+n)
    val_ref[...] = y[:, 0:1]
    logits = y[:, 1:1 + n_act]
    logits_ref[...] = logits

    # deterministic Categorical head: mode() and log_prob(mode)
    m = jnp.max(logits, axis=-1, keepdims=True)
    lse = m + jnp.log(jnp.sum(jnp.exp(logits - m), axis=-1, keepdims=True))
    alp_ref[...] = m - lse
    col = lax.broadcasted_iota(jnp.int32, logits.shape, 1).astype(jnp.float32)
    first_max = jnp.min(jnp.where(logits == m, col, jnp.float32(n_act)),
                        axis=-1, keepdims=True)
    act_ref[...] = first_max.astype(jnp.int32)


def tail_forward(p2, w2, b2, wfc3, bfc, wh, bh, *, batch, n_pos, n_act):
    K2 = p2.shape[1]
    ch2 = w2.shape[1]
    hidden = wfc3.shape[-1]
    nh = wh.shape[1]
    kernel = functools.partial(_tail_kernel, batch=batch, n_pos=n_pos,
                               n_act=n_act)
    return pl.pallas_call(
        kernel,
        out_shape=(
            jax.ShapeDtypeStruct((batch, 1), jnp.float32),       # value
            jax.ShapeDtypeStruct((batch, n_act), jnp.float32),   # logits
            jax.ShapeDtypeStruct((batch, 1), jnp.int32),         # mode action
            jax.ShapeDtypeStruct((batch, 1), jnp.float32),       # log_prob(mode)
        ),
        grid=(1,),
        in_specs=[
            pl.BlockSpec((n_pos * batch, K2), lambda i: (0, 0)),
            pl.BlockSpec((K2, ch2), lambda i: (0, 0)),
            pl.BlockSpec((1, ch2), lambda i: (0, 0)),
            pl.BlockSpec((n_pos, ch2, hidden), lambda i: (0, 0, 0)),
            pl.BlockSpec((1, hidden), lambda i: (0, 0)),
            pl.BlockSpec((hidden, nh), lambda i: (0, 0)),
            pl.BlockSpec((1, nh), lambda i: (0, 0)),
        ],
        out_specs=(
            pl.BlockSpec((batch, 1), lambda i: (0, 0)),
            pl.BlockSpec((batch, n_act), lambda i: (0, 0)),
            pl.BlockSpec((batch, 1), lambda i: (0, 0)),
            pl.BlockSpec((batch, 1), lambda i: (0, 0)),
        ),
        scratch_shapes=[pltpu.VMEM((n_pos * batch, ch2), jnp.float32)],
        compiler_params=pltpu.CompilerParams(dimension_semantics=("arbitrary",)),
    )(p2, w2, b2.reshape(1, ch2), wfc3, bfc.reshape(1, hidden), wh,
      bh.reshape(1, nh))


# ---------------------------------------------------------------------------
# Glue: im2col for a k == 2*stride VALID conv on NHWC input.  Only static
# slices + one transpose (no gathers).  Patch feature order is (kh, kw, c);
# row order is (b, i, j) or (i, j, b) depending on what the consumer wants.
# ---------------------------------------------------------------------------
def _im2col_k2s(x, s, *, batch_major_rows):
    B, H, W, C = x.shape
    OH, OW = H // s - 1, W // s - 1
    xb = x.reshape(B, H // s, s, W // s, s, C)
    parts = [xb[:, di:di + OH, :, dj:dj + OW, :, :]
             for di in (0, 1) for dj in (0, 1)]
    p = jnp.stack(parts, axis=0).reshape(2, 2, B, OH, s, OW, s, C)
    # dims: (di, dj, b, i, hs, j, ws, c)
    if batch_major_rows:
        p = p.transpose(2, 3, 5, 0, 4, 1, 6, 7)   # (b, i, j, di, hs, dj, ws, c)
    else:
        p = p.transpose(3, 5, 2, 0, 4, 1, 6, 7)   # (i, j, b, di, hs, dj, ws, c)
    return p.reshape(B * OH * OW, (2 * s) * (2 * s) * C), OH, OW


# ---------------------------------------------------------------------------
# Parameters.  make_torch_params mirrors the PyTorch layouts / init_ lambda
# (orthogonal_, zero bias).  prepare_kernel_params does the one-time layout
# plumbing: NHWC/(kh,kw,c) row permutation, /255 fold, fc-weight regrouping by
# spatial position, head fusion, bf16 cast of matmul operands.
# TODO(synk): the reference Categorical class usually re-inits its linear with
#             gain 0.01; that class was not provided, so plain orthogonal (gain
#             1) is used for it here, like the shown init_ lambda.
# ---------------------------------------------------------------------------
def _orthogonal(key, rows, cols):
    a = jax.random.normal(key, (max(rows, cols), min(rows, cols)), jnp.float32)
    q, r = jnp.linalg.qr(a)
    q = q * jnp.sign(jnp.diag(r))
    if rows < cols:
        q = q.T
    return q[:rows, :cols].astype(jnp.float32)


def make_torch_params(key, num_inputs=4, num_actions=6):
    ks = jax.random.split(key, 5)
    return {
        "w1": _orthogonal(ks[0], 16, num_inputs * 8 * 8).reshape(16, num_inputs, 8, 8),
        "b1": jnp.zeros((16,), jnp.float32),
        "w2": _orthogonal(ks[1], 32, 16 * 4 * 4).reshape(32, 16, 4, 4),
        "b2": jnp.zeros((32,), jnp.float32),
        "wfc": _orthogonal(ks[2], 256, 32 * 9 * 9),      # (256, 2592), (c,oh,ow)
        "bfc": jnp.zeros((256,), jnp.float32),
        "wv": _orthogonal(ks[3], 1, 256),
        "bv": jnp.zeros((1,), jnp.float32),
        "wd": _orthogonal(ks[4], num_actions, 256),
        "bd": jnp.zeros((num_actions,), jnp.float32),
    }


def prepare_kernel_params(tp):
    o1, c1, k1, _ = tp["w1"].shape
    o2, c2, k2, _ = tp["w2"].shape
    bf = jnp.bfloat16
    # conv weights -> matmul layout with (kh, kw, c) row order; /255 into w1.
    w1 = (tp["w1"].transpose(2, 3, 1, 0).reshape(k1 * k1 * c1, o1) / 255.0)
    w2 = tp["w2"].transpose(2, 3, 1, 0).reshape(k2 * k2 * c2, o2)
    # Linear(2592,256): torch flatten is (c, oh, ow); regroup per spatial
    # position -> (81, 32, 256) so the kernel can contract position-wise.
    wfc3 = tp["wfc"].reshape(256, o2, 9, 9).transpose(2, 3, 1, 0).reshape(81, o2, 256)
    # critic (256->1) and Categorical linear (256->n_act) fused into one matmul.
    wh = jnp.concatenate([tp["wv"].T, tp["wd"].T], axis=1)
    bh = jnp.concatenate([tp["bv"], tp["bd"]], axis=0)
    return {
        "w1": w1.astype(bf), "b1": tp["b1"],
        "w2": w2.astype(bf), "b2": tp["b2"],
        "wfc3": wfc3.astype(bf), "bfc": tp["bfc"],
        "wh": wh.astype(bf), "bh": bh,
    }


# ---------------------------------------------------------------------------
# Policy.act forward (no GRU: states pass through, masks unused).
# ---------------------------------------------------------------------------
@functools.partial(jax.jit, static_argnames=("deterministic",))
def policy_act(params, inputs, states, masks, deterministic=True, key=None):
    B = inputs.shape[0]
    n_act = params["wh"].shape[1] - 1

    # single NCHW -> NHWC transpose; everything else is folded into weights.
    x = inputs.transpose(0, 2, 3, 1).astype(jnp.bfloat16)

    # conv1 (8x8, stride 4) as im2col GEMM (kernel 1); /255 folded into w1.
    p1, oh1, ow1 = _im2col_k2s(x, 4, batch_major_rows=True)     # (B*400, 256)
    h1 = conv1_gemm(p1, params["w1"], params["b1"])             # (B*400, 16) bf16
    h1 = h1.reshape(B, oh1, ow1, 16)                            # free reshape

    # conv2 patches, rows position-major for the fused tail kernel.
    p2, oh2, ow2 = _im2col_k2s(h1, 2, batch_major_rows=False)   # (81*B, 256)

    # conv2 + fc + both heads + deterministic Categorical head (kernel 2).
    value, logits, action_det, alp_det = tail_forward(
        p2, params["w2"], params["b2"], params["wfc3"], params["bfc"],
        params["wh"], params["bh"],
        batch=B, n_pos=oh2 * ow2, n_act=n_act)

    if deterministic:
        action, action_log_probs = action_det, alp_det
    else:
        # TODO(synk): stochastic dist.sample() kept in plain JAX on the tiny
        #             (B, n_act) logits rather than in-kernel PRNG.
        assert key is not None, "stochastic action sampling needs a PRNG key"
        action = jax.random.categorical(key, logits, axis=-1)[:, None]
        logp = jax.nn.log_softmax(logits, axis=-1)
        action_log_probs = jnp.take_along_axis(logp, action, axis=-1)

    return value, action, action_log_probs, states


# ---------------------------------------------------------------------------
# Pure-JAX f32 reference of the PyTorch forward, for a numerical sanity check.
# ---------------------------------------------------------------------------
def reference_forward(tp, inputs):
    x = inputs.astype(jnp.float32) / 255.0
    dn = ("NCHW", "OIHW", "NCHW")
    y = lax.conv_general_dilated(x, tp["w1"], (4, 4), "VALID", dimension_numbers=dn)
    y = jax.nn.relu(y + tp["b1"][None, :, None, None])
    y = lax.conv_general_dilated(y, tp["w2"], (2, 2), "VALID", dimension_numbers=dn)
    y = jax.nn.relu(y + tp["b2"][None, :, None, None])
    f = y.reshape(y.shape[0], -1)
    h = jax.nn.relu(f @ tp["wfc"].T + tp["bfc"])
    value = h @ tp["wv"].T + tp["bv"]
    logits = h @ tp["wd"].T + tp["bd"]
    return value, logits


if __name__ == "__main__":
    key = jax.random.PRNGKey(0)
    pkey, xkey = jax.random.split(key)

    B, C, H, W = 2, 4, 84, 84          # 84x84 is required by Linear(32*9*9, 256)
    num_actions = 6

    tparams = make_torch_params(pkey, num_inputs=C, num_actions=num_actions)
    kparams = prepare_kernel_params(tparams)

    inputs = jax.random.uniform(xkey, (B, C, H, W), jnp.float32, 0.0, 255.0)
    states = jnp.zeros((B, 1), jnp.float32)
    masks = jnp.ones((B, 1), jnp.float32)

    value, action, action_log_probs, states_out = policy_act(
        kparams, inputs, states, masks, deterministic=True)
    jax.block_until_ready((value, action, action_log_probs, states_out))

    assert value.shape == (B, 1)
    assert action.shape == (B, 1)
    assert action_log_probs.shape == (B, 1)
    assert states_out.shape == (B, 1)

    # numerical sanity check against the f32 reference (bf16 MXU tolerance)
    ref_value, ref_logits = reference_forward(tparams, inputs)
    ref_logp = jax.nn.log_softmax(ref_logits, axis=-1)
    ref_action = jnp.argmax(ref_logits, axis=-1, keepdims=True)
    ref_alp = jnp.take_along_axis(ref_logp, ref_action, axis=-1)
    np.testing.assert_allclose(np.asarray(value), np.asarray(ref_value),
                               rtol=0.1, atol=0.1)
    np.testing.assert_allclose(np.asarray(action_log_probs), np.asarray(ref_alp),
                               rtol=0.1, atol=0.1)

    print("KERNEL_OK")
</pallas_src>

<mosaic_0001>
module attributes {stable_mosaic.version = 11 : i64} {
  func.func @_gemm_bias_relu_kernel(%arg0: i32, %arg1: memref<800x256xbf16, #tpu.memory_space<vmem>>, %arg2: memref<256x16xbf16, #tpu.memory_space<vmem>>, %arg3: memref<1x16xf32, #tpu.memory_space<vmem>>, %arg4: memref<800x16xbf16, #tpu.memory_space<vmem>>) attributes {dimension_semantics = [#tpu.dimension_semantics<arbitrary>], iteration_bounds = array<i64: 1>, scalar_prefetch = 0 : i64, scratch_operands = 0 : i64, tpu.core_type = #tpu.core_type<tc>, window_params = [{pipeline_mode = #tpu.pipeline_mode<synchronous>, transform_indices = @transform_0, window_bounds = array<i64: 800, 256>}, {pipeline_mode = #tpu.pipeline_mode<synchronous>, transform_indices = @transform_1, window_bounds = array<i64: 256, 16>}, {pipeline_mode = #tpu.pipeline_mode<synchronous>, transform_indices = @transform_2, window_bounds = array<i64: 1, 16>}, {pipeline_mode = #tpu.pipeline_mode<synchronous>, transform_indices = @transform_3, window_bounds = array<i64: 800, 16>}]} {
    %c0 = arith.constant 0 : index
    %c0_0 = arith.constant 0 : index
    %0 = vector.load %arg1[%c0, %c0_0] : memref<800x256xbf16, #tpu.memory_space<vmem>>, vector<800x256xbf16>
    %c0_1 = arith.constant 0 : index
    %c0_2 = arith.constant 0 : index
    %1 = vector.load %arg2[%c0_1, %c0_2] : memref<256x16xbf16, #tpu.memory_space<vmem>>, vector<256x16xbf16>
    %cst = arith.constant dense<0.000000e+00> : vector<800x16xf32>
    %2 = tpu.matmul %0, %1, %cst {dimension_numbers = #tpu.dot_dimension_numbers<[1], [0], [0], [1], [0, 0, 1, 1], [], []>} : vector<800x256xbf16>, vector<256x16xbf16>, vector<800x16xf32> -> vector<800x16xf32>
    %c0_3 = arith.constant 0 : index
    %c0_4 = arith.constant 0 : index
    %3 = vector.load %arg3[%c0_3, %c0_4] : memref<1x16xf32, #tpu.memory_space<vmem>>, vector<1x16xf32>
    %4 = vector.broadcast %3 : vector<1x16xf32> to vector<800x16xf32>
    %5 = arith.addf %2, %4 : vector<800x16xf32>
    %cst_5 = arith.constant 0.000000e+00 : f32
    %6 = vector.broadcast %cst_5 : f32 to vector<800x16xf32>
    %7 = arith.maximumf %5, %6 : vector<800x16xf32>
    %8 = arith.truncf %7 : vector<800x16xf32> to vector<800x16xbf16>
    %c0_6 = arith.constant 0 : index
    %c0_7 = arith.constant 0 : index
    %9 = vector.load %arg4[%c0_6, %c0_7] : memref<800x16xbf16, #tpu.memory_space<vmem>>, vector<800x16xbf16>
    tpu.vector_store %arg4[%c0_6, %c0_7], %8 {strides = array<i32>} : memref<800x16xbf16, #tpu.memory_space<vmem>>, vector<800x16xbf16>,
    return
  }
  func.func @transform_0(%arg0: i32) -> (i32, i32) {
    %c0_i32 = arith.constant 0 : i32
    %c0_i32_0 = arith.constant 0 : i32
    %c0_i32_1 = arith.constant 0 : i32
    return %c0_i32, %c0_i32_0 : i32, i32
  }
  func.func @transform_1(%arg0: i32) -> (i32, i32) {
    %c0_i32 = arith.constant 0 : i32
    %c0_i32_0 = arith.constant 0 : i32
    %c0_i32_1 = arith.constant 0 : i32
    return %c0_i32, %c0_i32_0 : i32, i32
  }
  func.func @transform_2(%arg0: i32) -> (i32, i32) {
    %c0_i32 = arith.constant 0 : i32
    %c0_i32_0 = arith.constant 0 : i32
    %c0_i32_1 = arith.constant 0 : i32
    return %c0_i32, %c0_i32_0 : i32, i32
  }
  func.func @transform_3(%arg0: i32) -> (i32, i32) {
    %c0_i32 = arith.constant 0 : i32
    %c0_i32_0 = arith.constant 0 : i32
    %c0_i32_1 = arith.constant 0 : i32
    return %c0_i32, %c0_i32_0 : i32, i32
  }
}

module attributes {stable_mosaic.version = 11 : i64} {
  func.func @_tail_kernel(%arg0: i32, %arg1: memref<162x256xbf16, #tpu.memory_space<vmem>>, %arg2: memref<256x32xbf16, #tpu.memory_space<vmem>>, %arg3: memref<1x32xf32, #tpu.memory_space<vmem>>, %arg4: memref<81x32x256xbf16, #tpu.memory_space<vmem>>, %arg5: memref<1x256xf32, #tpu.memory_space<vmem>>, %arg6: memref<256x7xbf16, #tpu.memory_space<vmem>>, %arg7: memref<1x7xf32, #tpu.memory_space<vmem>>, %arg8: memref<2x1xf32, #tpu.memory_space<vmem>>, %arg9: memref<2x6xf32, #tpu.memory_space<vmem>>, %arg10: memref<2x1xi32, #tpu.memory_space<vmem>>, %arg11: memref<2x1xf32, #tpu.memory_space<vmem>>, %arg12: memref<162x32xf32, #tpu.memory_space<vmem>>) attributes {dimension_semantics = [#tpu.dimension_semantics<arbitrary>], iteration_bounds = array<i64: 1>, scalar_prefetch = 0 : i64, scratch_operands = 1 : i64, tpu.core_type = #tpu.core_type<tc>, window_params = [{pipeline_mode = #tpu.pipeline_mode<synchronous>, transform_indices = @transform_0, window_bounds = array<i64: 162, 256>}, {pipeline_mode = #tpu.pipeline_mode<synchronous>, transform_indices = @transform_1, window_bounds = array<i64: 256, 32>}, {pipeline_mode = #tpu.pipeline_mode<synchronous>, transform_indices = @transform_2, window_bounds = array<i64: 1, 32>}, {pipeline_mode = #tpu.pipeline_mode<synchronous>, transform_indices = @transform_3, window_bounds = array<i64: 81, 32, 256>}, {pipeline_mode = #tpu.pipeline_mode<synchronous>, transform_indices = @transform_4, window_bounds = array<i64: 1, 256>}, {pipeline_mode = #tpu.pipeline_mode<synchronous>, transform_indices = @transform_5, window_bounds = array<i64: 256, 7>}, {pipeline_mode = #tpu.pipeline_mode<synchronous>, transform_indices = @transform_6, window_bounds = array<i64: 1, 7>}, {pipeline_mode = #tpu.pipeline_mode<synchronous>, transform_indices = @transform_7, window_bounds = array<i64: 2, 1>}, {pipeline_mode = #tpu.pipeline_mode<synchronous>, transform_indices = @transform_8, window_bounds = array<i64: 2, 6>}, {pipeline_mode = #tpu.pipeline_mode<synchronous>, transform_indices = @transform_9, window_bounds = array<i64: 2, 1>}, {pipeline_mode = #tpu.pipeline_mode<synchronous>, transform_indices = @transform_10, window_bounds = array<i64: 2, 1>}]} {
    %c0 = arith.constant 0 : index
    %c0_0 = arith.constant 0 : index
    %0 = vector.load %arg1[%c0, %c0_0] : memref<162x256xbf16, #tpu.memory_space<vmem>>, vector<162x256xbf16>
    %c0_1 = arith.constant 0 : index
    %c0_2 = arith.constant 0 : index
    %1 = vector.load %arg2[%c0_1, %c0_2] : memref<256x32xbf16, #tpu.memory_space<vmem>>, vector<256x32xbf16>
    %cst = arith.constant dense<0.000000e+00> : vector<162x32xf32>
    %2 = tpu.matmul %0, %1, %cst {dimension_numbers = #tpu.dot_dimension_numbers<[1], [0], [0], [1], [0, 0, 1, 1], [], []>} : vector<162x256xbf16>, vector<256x32xbf16>, vector<162x32xf32> -> vector<162x32xf32>
    %c0_3 = arith.constant 0 : index
    %c0_4 = arith.constant 0 : index
    %3 = vector.load %arg3[%c0_3, %c0_4] : memref<1x32xf32, #tpu.memory_space<vmem>>, vector<1x32xf32>
    %4 = vector.broadcast %3 : vector<1x32xf32> to vector<162x32xf32>
    %5 = arith.addf %2, %4 : vector<162x32xf32>
    %cst_5 = arith.constant 0.000000e+00 : f32
    %6 = vector.broadcast %cst_5 : f32 to vector<162x32xf32>
    %7 = arith.maximumf %5, %6 : vector<162x32xf32>
    %c0_6 = arith.constant 0 : index
    %c0_7 = arith.constant 0 : index
    %8 = vector.load %arg12[%c0_6, %c0_7] : memref<162x32xf32, #tpu.memory_space<vmem>>, vector<162x32xf32>
    tpu.vector_store %arg12[%c0_6, %c0_7], %7 {strides = array<i32>} : memref<162x32xf32, #tpu.memory_space<vmem>>, vector<162x32xf32>,
    %cst_8 = arith.constant 0.000000e+00 : f32
    %9 = vector.broadcast %cst_8 : f32 to vector<2x256xf32>
    %c0_i32 = arith.constant 0 : i32
    %c81_i32 = arith.constant 81 : i32
    %10 = arith.addi %c0_i32, %c81_i32 : i32
    %c1_i32 = arith.constant 1 : i32
    %11 = scf.for %arg13 = %c0_i32 to %10 step %c1_i32 iter_args(%arg14 = %9) -> (vector<2x256xf32>)  : i32 {
      %c2_i32 = arith.constant 2 : i32
      %48 = arith.muli %arg13, %c2_i32 : i32
      %49 = tpu.assume_multiple %48, 2 : i32
      %50 = arith.index_cast %49 : i32 to index
      %c0_30 = arith.constant 0 : index
      %51 = vector.load %arg12[%50, %c0_30] : memref<162x32xf32, #tpu.memory_space<vmem>>, vector<2x32xf32>
      %52 = arith.truncf %51 : vector<2x32xf32> to vector<2x32xbf16>
      %53 = arith.index_cast %arg13 : i32 to index
      %c0_31 = arith.constant 0 : index
      %c0_32 = arith.constant 0 : index
      %54 = vector.load %arg4[%53, %c0_31, %c0_32] : memref<81x32x256xbf16, #tpu.memory_space<vmem>>, vector<1x32x256xbf16>
      %55 = vector.shape_cast %54 : vector<1x32x256xbf16> to vector<32x256xbf16>
      %cst_33 = arith.constant dense<0.000000e+00> : vector<2x256xf32>
      %56 = tpu.matmul %52, %55, %cst_33 {dimension_numbers = #tpu.dot_dimension_numbers<[1], [0], [0], [1], [0, 0, 1, 1], [], []>} : vector<2x32xbf16>, vector<32x256xbf16>, vector<2x256xf32> -> vector<2x256xf32>
      %57 = arith.addf %arg14, %56 : vector<2x256xf32>
      scf.yield %57 : vector<2x256xf32>
    }
    %c81_i32_9 = arith.constant 81 : i32
    %c0_10 = arith.constant 0 : index
    %c0_11 = arith.constant 0 : index
    %12 = vector.load %arg5[%c0_10, %c0_11] : memref<1x256xf32, #tpu.memory_space<vmem>>, vector<1x256xf32>
    %13 = vector.broadcast %12 : vector<1x256xf32> to vector<2x256xf32>
    %14 = arith.addf %11, %13 : vector<2x256xf32>
    %cst_12 = arith.constant 0.000000e+00 : f32
    %15 = vector.broadcast %cst_12 : f32 to vector<2x256xf32>
    %16 = arith.maximumf %14, %15 : vector<2x256xf32>
    %17 = arith.truncf %16 : vector<2x256xf32> to vector<2x256xbf16>
    %c0_13 = arith.constant 0 : index
    %c0_14 = arith.constant 0 : index
    %18 = vector.load %arg6[%c0_13, %c0_14] : memref<256x7xbf16, #tpu.memory_space<vmem>>, vector<256x7xbf16>
    %cst_15 = arith.constant dense<0.000000e+00> : vector<2x7xf32>
    %19 = tpu.matmul %17, %18, %cst_15 {dimension_numbers = #tpu.dot_dimension_numbers<[1], [0], [0], [1], [0, 0, 1, 1], [], []>} : vector<2x256xbf16>, vector<256x7xbf16>, vector<2x7xf32> -> vector<2x7xf32>
    %c0_16 = arith.constant 0 : index
    %c0_17 = arith.constant 0 : index
    %20 = vector.load %arg7[%c0_16, %c0_17] : memref<1x7xf32, #tpu.memory_space<vmem>>, vector<1x7xf32>
    %21 = vector.broadcast %20 : vector<1x7xf32> to vector<2x7xf32>
    %22 = arith.addf %19, %21 : vector<2x7xf32>
    %23 = vector.extract_strided_slice %22 {offsets = [0, 0], sizes = [2, 1], strides = [1, 1]} : vector<2x7xf32> to vector<2x1xf32>
    %c0_18 = arith.constant 0 : index
    %c0_19 = arith.constant 0 : index
    %24 = vector.load %arg8[%c0_18, %c0_19] : memref<2x1xf32, #tpu.memory_space<vmem>>, vector<2x1xf32>
    tpu.vector_store %arg8[%c0_18, %c0_19], %23 {strides = array<i32>} : memref<2x1xf32, #tpu.memory_space<vmem>>, vector<2x1xf32>,
    %25 = vector.extract_strided_slice %22 {offsets = [0, 1], sizes = [2, 6], strides = [1, 1]} : vector<2x7xf32> to vector<2x6xf32>
    %c0_20 = arith.constant 0 : index
    %c0_21 = arith.constant 0 : index
    %26 = vector.load %arg9[%c0_20, %c0_21] : memref<2x6xf32, #tpu.memory_space<vmem>>, vector<2x6xf32>
    tpu.vector_store %arg9[%c0_20, %c0_21], %25 {strides = array<i32>} : memref<2x6xf32, #tpu.memory_space<vmem>>, vector<2x6xf32>,
    %cst_22 = arith.constant dense<0xFF800000> : vector<2xf32>
    %27 = vector.multi_reduction <maximumf>, %25, %cst_22 [1] : vector<2x6xf32> to vector<2xf32>
    %28 = vector.shape_cast %27 : vector<2xf32> to vector<2x1xf32>
    %29 = vector.broadcast %28 : vector<2x1xf32> to vector<2x6xf32>
    %30 = arith.subf %25, %29 : vector<2x6xf32>
    %31 = math.exp %30 : vector<2x6xf32>
    %cst_23 = arith.constant dense<0.000000e+00> : vector<2xf32>
    %32 = vector.multi_reduction <add>, %31, %cst_23 [1] : vector<2x6xf32> to vector<2xf32>
    %33 = vector.shape_cast %32 : vector<2xf32> to vector<2x1xf32>
    %34 = math.log %33 : vector<2x1xf32>
    %35 = arith.addf %28, %34 : vector<2x1xf32>
    %36 = arith.subf %28, %35 : vector<2x1xf32>
    %c0_24 = arith.constant 0 : index
    %c0_25 = arith.constant 0 : index
    %37 = vector.load %arg11[%c0_24, %c0_25] : memref<2x1xf32, #tpu.memory_space<vmem>>, vector<2x1xf32>
    tpu.vector_store %arg11[%c0_24, %c0_25], %36 {strides = array<i32>} : memref<2x1xf32, #tpu.memory_space<vmem>>, vector<2x1xf32>,
    %38 = tpu.iota {dimensions = array<i32: 1>} : vector<2x6xi32>
    %39 = arith.sitofp %38 : vector<2x6xi32> to vector<2x6xf32>
    %40 = vector.broadcast %28 : vector<2x1xf32> to vector<2x6xf32>
    %41 = arith.cmpf oeq, %25, %40 : vector<2x6xf32>
    %cst_26 = arith.constant 6.000000e+00 : f32
    %42 = vector.broadcast %cst_26 : f32 to vector<2x6xf32>
    %43 = arith.select %41, %39, %42 : vector<2x6xi1>, vector<2x6xf32>
    %cst_27 = arith.constant dense<0x7F800000> : vector<2xf32>
    %44 = vector.multi_reduction <minimumf>, %43, %cst_27 [1] : vector<2x6xf32> to vector<2xf32>
    %45 = vector.shape_cast %44 : vector<2xf32> to vector<2x1xf32>
    %46 = arith.fptosi %45 : vector<2x1xf32> to vector<2x1xi32>
    %c0_28 = arith.constant 0 : index
    %c0_29 = arith.constant 0 : index
    %47 = vector.load %arg10[%c0_28, %c0_29] : memref<2x1xi32, #tpu.memory_space<vmem>>, vector<2x1xi32>
    tpu.vector_store %arg10[%c0_28, %c0_29], %46 {strides = array<i32>} : memref<2x1xi32, #tpu.memory_space<vmem>>, vector<2x1xi32>,
    return
  }
  func.func @transform_0(%arg0: i32) -> (i32, i32) {
    %c0_i32 = arith.constant 0 : i32
    %c0_i32_0 = arith.constant 0 : i32
    %c0_i32_1 = arith.constant 0 : i32
    return %c0_i32, %c0_i32_0 : i32, i32
  }
  func.func @transform_1(%arg0: i32) -> (i32, i32) {
    %c0_i32 = arith.constant 0 : i32
    %c0_i32_0 = arith.constant 0 : i32
    %c0_i32_1 = arith.constant 0 : i32
    return %c0_i32, %c0_i32_0 : i32, i32
  }
  func.func @transform_2(%arg0: i32) -> (i32, i32) {
    %c0_i32 = arith.constant 0 : i32
    %c0_i32_0 = arith.constant 0 : i32
    %c0_i32_1 = arith.constant 0 : i32
    return %c0_i32, %c0_i32_0 : i32, i32
  }
  func.func @transform_3(%arg0: i32) -> (i32, i32, i32) {
    %c0_i32 = arith.constant 0 : i32
    %c0_i32_0 = arith.constant 0 : i32
    %c0_i32_1 = arith.constant 0 : i32
    %c0_i32_2 = arith.constant 0 : i32
    return %c0_i32, %c0_i32_0, %c0_i32_1 : i32, i32, i32
  }
  func.func @transform_4(%arg0: i32) -> (i32, i32) {
    %c0_i32 = arith.constant 0 : i32
    %c0_i32_0 = arith.constant 0 : i32
    %c0_i32_1 = arith.constant 0 : i32
    return %c0_i32, %c0_i32_0 : i32, i32
  }
  func.func @transform_5(%arg0: i32) -> (i32, i32) {
    %c0_i32 = arith.constant 0 : i32
    %c0_i32_0 = arith.constant 0 : i32
    %c0_i32_1 = arith.constant 0 : i32
    return %c0_i32, %c0_i32_0 : i32, i32
  }
  func.func @transform_6(%arg0: i32) -> (i32, i32) {
    %c0_i32 = arith.constant 0 : i32
    %c0_i32_0 = arith.constant 0 : i32
    %c0_i32_1 = arith.constant 0 : i32
    return %c0_i32, %c0_i32_0 : i32, i32
  }
  func.func @transform_7(%arg0: i32) -> (i32, i32) {
    %c0_i32 = arith.constant 0 : i32
    %c0_i32_0 = arith.constant 0 : i32
    %c0_i32_1 = arith.constant 0 : i32
    return %c0_i32, %c0_i32_0 : i32, i32
  }
  func.func @transform_8(%arg0: i32) -> (i32, i32) {
    %c0_i32 = arith.constant 0 : i32
    %c0_i32_0 = arith.constant 0 : i32
    %c0_i32_1 = arith.constant 0 : i32
    return %c0_i32, %c0_i32_0 : i32, i32
  }
  func.func @transform_9(%arg0: i32) -> (i32, i32) {
    %c0_i32 = arith.constant 0 : i32
    %c0_i32_0 = arith.constant 0 : i32
    %c0_i32_1 = arith.constant 0 : i32
    return %c0_i32, %c0_i32_0 : i32, i32
  }
  func.func @transform_10(%arg0: i32) -> (i32, i32) {
    %c0_i32 = arith.constant 0 : i32
    %c0_i32_0 = arith.constant 0 : i32
    %c0_i32_1 = arith.constant 0 : i32
    return %c0_i32, %c0_i32_0 : i32, i32
  }
}

</mosaic_0001>

<bundles_post_ra>
// kernel: policy_act.2
= control target key start
LH: loop header
LB: loop body
LE: loop exit
PB: predicated region body
PF: predicated region fallthrough
CT: control target
= control target key end

     0   :  { %v2305_v0 = vmov 0   ;;  %vm1683_vm0 = vcmask 125952   ;;  %s3216_s1 = inlined_call_operand.vmem [shape: bf16[256,16], index: 1, kind: input, shape index: {}]   ;;  %s3217_s0 = inlined_call_operand.vmem [shape: bf16[800,256], index: 0, kind: input, shape index: {}]   ;;  %s3218_s2 = inlined_call_operand.vmem [shape: f32[1,16], index: 2, kind: input, shape index: {}]   ;;  %s3219_s3 = inlined_call_operand.vmem [shape: bf16[800,16], index: 3, kind: output, shape index: {}]  }
   0x1   :  { %750 = vmatprep.subr.bf16.mxu0 %v2305_v0  ;;  %2105 = vmatprep.subr.bf16.mxu1 %v2305_v0  ;;  %v2138_v1 = vld [vmem:[%s3216_s1] sm:$0xff]   ;;  %v2139_v2 = vld [vmem:[%s3216_s1 + $0x8] sm:$0xff]   ;;  %v2140_v3 = vld [vmem:[%s3216_s1 + $0x10] sm:$0xff]  }
   0x2   :  { %751 = vmatpush1.bf16.msra.mxu0 %v2138_v1  ;;  %2121 = vmatpush1.bf16.msra.mxu1 %v2138_v1  ;;  %v2141_v4 = vld [vmem:[%s3216_s1 + $0x18] sm:$0xff]   ;;  %v2142_v5 = vld [vmem:[%s3216_s1 + $0x20] sm:$0xff]   ;;  %v2143_v7 = vld [vmem:[%s3216_s1 + $0x28] sm:$0xff]  }
   0x3   :  { %752 = vmatprep.subr.bf16.mxu0 %v2305_v0  ;;  %2106 = vmatprep.subr.bf16.mxu1 %v2305_v0  ;;  %v2156_v6 = vld [vmem:[%s3217_s0 + $0x4] ss:$8 sps:$4 sm:$0xff]   ;;  %v2159_v8 = vld [vmem:[%s3217_s0 + $0x194] ss:$8 sps:$4 sm:$0xff]   ;;  %v2154_v19 = vld [vmem:[%s3217_s0] ss:$8 sps:$4 sm:$0xff]  }
   0x4   :  { %782 = vmatprep.mubr.bf16.mxu0 %v2156_v6  ;;  %982 = vmatprep.mubr.bf16.mxu1 %v2159_v8  ;;  %v2144_v9 = vld [vmem:[%s3216_s1 + $0x30] sm:$0xff]   ;;  %v2145_v10 = vld [vmem:[%s3216_s1 + $0x38] sm:$0xff]   ;;  %v2146_v11 = vld [vmem:[%s3216_s1 + $0x40] sm:$0xff]  }
   0x5   :  { %v2147_v12 = vld [vmem:[%s3216_s1 + $0x48] sm:$0xff]   ;;  %v2148_v13 = vld [vmem:[%s3216_s1 + $0x50] sm:$0xff]   ;;  %v2149_v14 = vld [vmem:[%s3216_s1 + $0x58] sm:$0xff]  }
   0x6   :  { %753 = vmatpush1.bf16.msra.mxu0 %v2139_v2  ;;  %2122 = vmatpush1.bf16.msra.mxu1 %v2139_v2  ;;  %v2150_v15 = vld [vmem:[%s3216_s1 + $0x60] sm:$0xff]   ;;  %v2151_v16 = vld [vmem:[%s3216_s1 + $0x68] sm:$0xff]   ;;  %v2152_v17 = vld [vmem:[%s3216_s1 + $0x70] sm:$0xff]  }
   0x7   :  { %754 = vmatprep.subr.bf16.mxu0 %v2305_v0  ;;  %2107 = vmatprep.subr.bf16.mxu1 %v2305_v0  ;;  %v2153_v18 = vld [vmem:[%s3216_s1 + $0x78] sm:$0xff]   ;;  %v2162_v22 = vld [vmem:[%s3217_s0 + $0x1a4] ss:$8 sps:$4 sm:$0xff]   ;;  %v2165_v24 = vld [vmem:[%s3217_s0 + $0x1a0] ss:$8 sps:$4 sm:$0xff]  }
   0x8   :  { %v2157_v20 = vld [vmem:[%s3217_s0 + $0x190] ss:$8 sps:$4 sm:$0xff]   ;;  %v2160_v21 = vld [vmem:[%s3217_s0 + $0x14] ss:$8 sps:$4 sm:$0xff]   ;;  %v2166_v25 = vld [vmem:[%s3217_s0 + $0x24] ss:$8 sps:$4 sm:$0xff]  }
   0x9   :  { %v2164_v23 = vld [vmem:[%s3217_s0 + $0x10] ss:$8 sps:$4 sm:$0xff]   ;;  %v2168_v26 = vld [vmem:[%s3217_s0 + $0x1b4] ss:$8 sps:$4 sm:$0xff]   ;;  %v2170_v27 = vld [vmem:[%s3217_s0 + $0x20] ss:$8 sps:$4 sm:$0xff]  }
   0xa   :  { %755 = vmatpush1.bf16.msra.mxu0 %v2140_v3  ;;  %2123 = vmatpush1.bf16.msra.mxu1 %v2140_v3  ;;  %v2171_v28 = vld [vmem:[%s3217_s0 + $0x1b0] ss:$8 sps:$4 sm:$0xff]   ;;  %v2172_v29 = vld [vmem:[%s3217_s0 + $0x34] ss:$8 sps:$4 sm:$0xff]   ;;  %v2174_v30 = vld [vmem:[%s3217_s0 + $0x1c4] ss:$8 sps:$4 sm:$0xff]  }
   0xb   :  { %756 = vmatprep.subr.bf16.mxu0 %v2305_v0  ;;  %2108 = vmatprep.subr.bf16.mxu1 %v2305_v0  ;;  %v2176_v31 = vld [vmem:[%s3217_s0 + $0x30] ss:$8 sps:$4 sm:$0xff]   ;;  %v2177_v32 = vld [vmem:[%s3217_s0 + $0x1c0] ss:$8 sps:$4 sm:$0xff]   ;;  %v2178_v33 = vld [vmem:[%s3217_s0 + $0x44] ss:$8 sps:$4 sm:$0xff]  }
   0xc   :  { %v2180_v34 = vld [vmem:[%s3217_s0 + $0x1d4] ss:$8 sps:$4 sm:$0xff]   ;;  %v2182_v35 = vld [vmem:[%s3217_s0 + $0x40] ss:$8 sps:$4 sm:$0xff]   ;;  %v2183_v36 = vld [vmem:[%s3217_s0 + $0x1d0] ss:$8 sps:$4 sm:$0xff]  }
   0xd   :  { %v2184_v37 = vld [vmem:[%s3217_s0 + $0x54] ss:$8 sps:$4 sm:$0xff]   ;;  %v2186_v38 = vld [vmem:[%s3217_s0 + $0x1e4] ss:$8 sps:$4 sm:$0xff]   ;;  %v2188_v39 = vld [vmem:[%s3217_s0 + $0x50] ss:$8 sps:$4 sm:$0xff]  }
   0xe   :  { %757 = vmatpush1.bf16.msra.mxu0 %v2141_v4  ;;  %2124 = vmatpush1.bf16.msra.mxu1 %v2141_v4  ;;  %v2189_v40 = vld [vmem:[%s3217_s0 + $0x1e0] ss:$8 sps:$4 sm:$0xff]   ;;  %v2190_v41 = vld [vmem:[%s3217_s0 + $0x64] ss:$8 sps:$4 sm:$0xff]   ;;  %v2192_v42 = vld [vmem:[%s3217_s0 + $0x1f4] ss:$8 sps:$4 sm:$0xff]  }
   0xf   :  { %758 = vmatprep.subr.bf16.mxu0 %v2305_v0  ;;  %2109 = vmatprep.subr.bf16.mxu1 %v2305_v0  ;;  %v2194_v43 = vld [vmem:[%s3217_s0 + $0x60] ss:$8 sps:$4 sm:$0xff]   ;;  %v2195_v44 = vld [vmem:[%s3217_s0 + $0x1f0] ss:$8 sps:$4 sm:$0xff]   ;;  %v2196_v45 = vld [vmem:[%s3217_s0 + $0x74] ss:$8 sps:$4 sm:$0xff]  }
  0x10   :  { %v2198_v46 = vld [vmem:[%s3217_s0 + $0x204] ss:$8 sps:$4 sm:$0xff]   ;;  %v2200_v47 = vld [vmem:[%s3217_s0 + $0x70] ss:$8 sps:$4 sm:$0xff]   ;;  %v2201_v48 = vld [vmem:[%s3217_s0 + $0x200] ss:$8 sps:$4 sm:$0xff]  }
  0x11   :  { %v2202_v49 = vld [vmem:[%s3217_s0 + $0x84] ss:$8 sps:$4 sm:$0xff]   ;;  %v2204_v50 = vld [vmem:[%s3217_s0 + $0x214] ss:$8 sps:$4 sm:$0xff]   ;;  %v2206_v51 = vld [vmem:[%s3217_s0 + $0x80] ss:$8 sps:$4 sm:$0xff]  }
  0x12   :  { %759 = vmatpush1.bf16.msra.mxu0 %v2142_v5  ;;  %2125 = vmatpush1.bf16.msra.mxu1 %v2142_v5  ;;  %v2207_v52 = vld [vmem:[%s3217_s0 + $0x210] ss:$8 sps:$4 sm:$0xff]   ;;  %v2208_v53 = vld [vmem:[%s3217_s0 + $0x94] ss:$8 sps:$4 sm:$0xff]   ;;  %v2210_v54 = vld [vmem:[%s3217_s0 + $0x224] ss:$8 sps:$4 sm:$0xff]  }
  0x13   :  { %760 = vmatprep.subr.bf16.mxu0 %v2305_v0  ;;  %2110 = vmatprep.subr.bf16.mxu1 %v2305_v0  ;;  %v2212_v55 = vld [vmem:[%s3217_s0 + $0x90] ss:$8 sps:$4 sm:$0xff]   ;;  %v2213_v56 = vld [vmem:[%s3217_s0 + $0x220] ss:$8 sps:$4 sm:$0xff]   ;;  %v2214_v57 = vld [vmem:[%s3217_s0 + $0xa4] ss:$8 sps:$4 sm:$0xff]  }
  0x14   :  { %v2216_v58 = vld [vmem:[%s3217_s0 + $0x234] ss:$8 sps:$4 sm:$0xff]   ;;  %v2218_v59 = vld [vmem:[%s3217_s0 + $0xa0] ss:$8 sps:$4 sm:$0xff]   ;;  %v2219_v60 = vld [vmem:[%s3217_s0 + $0x230] ss:$8 sps:$4 sm:$0xff]  }
  0x15   :  { %v2220_v61 = vld [vmem:[%s3217_s0 + $0xb4] ss:$8 sps:$4 sm:$0xff]   ;;  %v2222_v62 = vld [vmem:[%s3217_s0 + $0x244] ss:$8 sps:$4 sm:$0xff]   ;;  %v2224_v63 = vld [vmem:[%s3217_s0 + $0xb0] ss:$8 sps:$4 sm:$0xff]  }
  0x16   :  { %761 = vmatpush1.bf16.msra.mxu0 %v2143_v7  ;;  %2126 = vmatpush1.bf16.msra.mxu1 %v2143_v7  ;;  %v2226_v1 = vld [vmem:[%s3217_s0 + $0xc4] ss:$8 sps:$4 sm:$0xff]   ;;  %v2228_v2 = vld [vmem:[%s3217_s0 + $0x254] ss:$8 sps:$4 sm:$0xff]   ;;  %v2230_v3 = vld [vmem:[%s3217_s0 + $0xc0] ss:$8 sps:$4 sm:$0xff]  }
  0x17   :  { %762 = vmatprep.subr.bf16.mxu0 %v2305_v0  ;;  %2111 = vmatprep.subr.bf16.mxu1 %v2305_v0  ;;  %v2231_v4 = vld [vmem:[%s3217_s0 + $0x250] ss:$8 sps:$4 sm:$0xff]   ;;  %v2232_v5 = vld [vmem:[%s3217_s0 + $0xd4] ss:$8 sps:$4 sm:$0xff]   ;;  %v2234_v6 = vld [vmem:[%s3217_s0 + $0x264] ss:$8 sps:$4 sm:$0xff]  }
  0x18   :  { %v2236_v7 = vld [vmem:[%s3217_s0 + $0xd0] ss:$8 sps:$4 sm:$0xff]   ;;  %v2237_v8 = vld [vmem:[%s3217_s0 + $0x260] ss:$8 sps:$4 sm:$0xff]  }
  0x1a   :  { %763 = vmatpush1.bf16.msra.mxu0 %v2144_v9  ;;  %2127 = vmatpush1.bf16.msra.mxu1 %v2144_v9  ;;  %v2238_v9 = vld [vmem:[%s3217_s0 + $0xe4] ss:$8 sps:$4 sm:$0xff]  }
  0x1b   :  { %764 = vmatprep.subr.bf16.mxu0 %v2305_v0  ;;  %2112 = vmatprep.subr.bf16.mxu1 %v2305_v0 }
  0x1e   :  { %765 = vmatpush1.bf16.msra.mxu0 %v2145_v10  ;;  %2128 = vmatpush1.bf16.msra.mxu1 %v2145_v10  ;;  %v2240_v10 = vld [vmem:[%s3217_s0 + $0x274] ss:$8 sps:$4 sm:$0xff]  }
  0x1f   :  { %766 = vmatprep.subr.bf16.mxu0 %v2305_v0  ;;  %2113 = vmatprep.subr.bf16.mxu1 %v2305_v0 }
  0x22   :  { %767 = vmatpush1.bf16.msra.mxu0 %v2146_v11  ;;  %2129 = vmatpush1.bf16.msra.mxu1 %v2146_v11  ;;  %v2242_v11 = vld [vmem:[%s3217_s0 + $0xe0] ss:$8 sps:$4 sm:$0xff]  }
  0x23   :  { %768 = vmatprep.subr.bf16.mxu0 %v2305_v0  ;;  %2114 = vmatprep.subr.bf16.mxu1 %v2305_v0 }
  0x26   :  { %769 = vmatpush1.bf16.msra.mxu0 %v2147_v12  ;;  %2130 = vmatpush1.bf16.msra.mxu1 %v2147_v12  ;;  %v2243_v12 = vld [vmem:[%s3217_s0 + $0x270] ss:$8 sps:$4 sm:$0xff]  }
  0x27   :  { %770 = vmatprep.subr.bf16.mxu0 %v2305_v0  ;;  %2115 = vmatprep.subr.bf16.mxu1 %v2305_v0 }
  0x2a   :  { %771 = vmatpush1.bf16.msra.mxu0 %v2148_v13  ;;  %2131 = vmatpush1.bf16.msra.mxu1 %v2148_v13  ;;  %v2244_v13 = vld [vmem:[%s3217_s0 + $0xf4] ss:$8 sps:$4 sm:$0xff]  }
  0x2b   :  { %772 = vmatprep.subr.bf16.mxu0 %v2305_v0  ;;  %2116 = vmatprep.subr.bf16.mxu1 %v2305_v0 }
  0x2e   :  { %773 = vmatpush1.bf16.msra.mxu0 %v2149_v14  ;;  %2132 = vmatpush1.bf16.msra.mxu1 %v2149_v14  ;;  %v2246_v14 = vld [vmem:[%s3217_s0 + $0x284] ss:$8 sps:$4 sm:$0xff]  }
  0x2f   :  { %774 = vmatprep.subr.bf16.mxu0 %v2305_v0  ;;  %2117 = vmatprep.subr.bf16.mxu1 %v2305_v0 }
  0x32   :  { %775 = vmatpush1.bf16.msra.mxu0 %v2150_v15  ;;  %2133 = vmatpush1.bf16.msra.mxu1 %v2150_v15  ;;  %v2248_v15 = vld [vmem:[%s3217_s0 + $0xf0] ss:$8 sps:$4 sm:$0xff]  }
  0x33   :  { %776 = vmatprep.subr.bf16.mxu0 %v2305_v0  ;;  %2118 = vmatprep.subr.bf16.mxu1 %v2305_v0 }
  0x36   :  { %777 = vmatpush1.bf16.msra.mxu0 %v2151_v16  ;;  %2134 = vmatpush1.bf16.msra.mxu1 %v2151_v16  ;;  %v2249_v16 = vld [vmem:[%s3217_s0 + $0x280] ss:$8 sps:$4 sm:$0xff]  }
  0x37   :  { %778 = vmatprep.subr.bf16.mxu0 %v2305_v0  ;;  %2119 = vmatprep.subr.bf16.mxu1 %v2305_v0 }
  0x3a   :  { %779 = vmatpush1.bf16.msra.mxu0 %v2152_v17  ;;  %2135 = vmatpush1.bf16.msra.mxu1 %v2152_v17  ;;  %v2250_v17 = vld [vmem:[%s3217_s0 + $0x104] ss:$8 sps:$4 sm:$0xff]  }
  0x3b   :  { %780 = vmatprep.subr.bf16.mxu0 %v2305_v0  ;;  %2120 = vmatprep.subr.bf16.mxu1 %v2305_v0  ;;  %v2225_v0 = vld [vmem:[%s3217_s0 + $0x240] ss:$8 sps:$4 sm:$0xff]  }
  0x3e   :  { %781 = vmatpush1.bf16.msra.mxu0 %v2153_v18  ;;  %2136 = vmatpush1.bf16.msra.mxu1 %v2153_v18  ;;  %v2252_v18 = vld [vmem:[%s3217_s0 + $0x294] ss:$8 sps:$4 sm:$0xff]  }
  0x41   :  { %783 = vmatmul.mubr.bf16.vlgmr.msra.gmra.mrb[0].mxu0 %v2154_v19  ;;  %983 = vmatmul.mubr.bf16.vlgmr.msra.gmra.mrb[0].mxu1 %v2157_v20  ;;  %v2254_v19 = vld [vmem:[%s3217_s0 + $0x100] ss:$8 sps:$4 sm:$0xff]   ;;  %v2255_v20 = vld [vmem:[%s3217_s0 + $0x290] ss:$8 sps:$4 sm:$0xff]  }
  0x42   :  { %790 = vmatprep.mubr.bf16.mxu0 %v2160_v21  ;;  %990 = vmatprep.mubr.bf16.mxu1 %v2162_v22  ;;  %v2256_v21 = vld [vmem:[%s3217_s0 + $0x114] ss:$8 sps:$4 sm:$0xff]   ;;  %v2258_v22 = vld [vmem:[%s3217_s0 + $0x2a4] ss:$8 sps:$4 sm:$0xff]  }
  0x49   :  { %791 = vmatmul.mubr.bf16.gmra.mrb[4].mxu0 %v2164_v23  ;;  %991 = vmatmul.mubr.bf16.gmra.mrb[4].mxu1 %v2165_v24  ;;  %v2260_v23 = vld [vmem:[%s3217_s0 + $0x110] ss:$8 sps:$4 sm:$0xff]   ;;  %v2261_v24 = vld [vmem:[%s3217_s0 + $0x2a0] ss:$8 sps:$4 sm:$0xff]  }
  0x4a   :  { %798 = vmatprep.mubr.bf16.mxu0 %v2166_v25  ;;  %998 = vmatprep.mubr.bf16.mxu1 %v2168_v26  ;;  %v2262_v25 = vld [vmem:[%s3217_s0 + $0x124] ss:$8 sps:$4 sm:$0xff]   ;;  %v2264_v26 = vld [vmem:[%s3217_s0 + $0x2b4] ss:$8 sps:$4 sm:$0xff]  }
  0x51   :  { %799 = vmatmul.mubr.bf16.gmra.mrb[8].mxu0 %v2170_v27  ;;  %999 = vmatmul.mubr.bf16.gmra.mrb[8].mxu1 %v2171_v28  ;;  %v2266_v27 = vld [vmem:[%s3217_s0 + $0x120] ss:$8 sps:$4 sm:$0xff]   ;;  %v2267_v28 = vld [vmem:[%s3217_s0 + $0x2b0] ss:$8 sps:$4 sm:$0xff]  }
  0x52   :  { %806 = vmatprep.mubr.bf16.mxu0 %v2172_v29  ;;  %1006 = vmatprep.mubr.bf16.mxu1 %v2174_v30  ;;  %v2268_v29 = vld [vmem:[%s3217_s0 + $0x134] ss:$8 sps:$4 sm:$0xff]   ;;  %v2270_v30 = vld [vmem:[%s3217_s0 + $0x2c4] ss:$8 sps:$4 sm:$0xff]  }
  0x59   :  { %807 = vmatmul.mubr.bf16.gmra.mrb[12].mxu0 %v2176_v31  ;;  %1007 = vmatmul.mubr.bf16.gmra.mrb[12].mxu1 %v2177_v32  ;;  %v2272_v31 = vld [vmem:[%s3217_s0 + $0x130] ss:$8 sps:$4 sm:$0xff]   ;;  %v2273_v32 = vld [vmem:[%s3217_s0 + $0x2c0] ss:$8 sps:$4 sm:$0xff]  }
  0x5a   :  { %814 = vmatprep.mubr.bf16.mxu0 %v2178_v33  ;;  %1014 = vmatprep.mubr.bf16.mxu1 %v2180_v34  ;;  %v2274_v33 = vld [vmem:[%s3217_s0 + $0x144] ss:$8 sps:$4 sm:$0xff]   ;;  %v2276_v34 = vld [vmem:[%s3217_s0 + $0x2d4] ss:$8 sps:$4 sm:$0xff]  }
  0x61   :  { %815 = vmatmul.mubr.bf16.gmra.mrb[16].mxu0 %v2182_v35  ;;  %1015 = vmatmul.mubr.bf16.gmra.mrb[16].mxu1 %v2183_v36  ;;  %v2278_v35 = vld [vmem:[%s3217_s0 + $0x140] ss:$8 sps:$4 sm:$0xff]   ;;  %v2279_v36 = vld [vmem:[%s3217_s0 + $0x2d0] ss:$8 sps:$4 sm:$0xff]  }
  0x62   :  { %822 = vmatprep.mubr.bf16.mxu0 %v2184_v37  ;;  %1022 = vmatprep.mubr.bf16.mxu1 %v2186_v38  ;;  %v2280_v37 = vld [vmem:[%s3217_s0 + $0x154] ss:$8 sps:$4 sm:$0xff]   ;;  %v2282_v38 = vld [vmem:[%s3217_s0 + $0x2e4] ss:$8 sps:$4 sm:$0xff]  }
  0x69   :  { %823 = vmatmul.mubr.bf16.gmra.mrb[20].mxu0 %v2188_v39  ;;  %1023 = vmatmul.mubr.bf16.gmra.mrb[20].mxu1 %v2189_v40  ;;  %v2284_v39 = vld [vmem:[%s3217_s0 + $0x150] ss:$8 sps:$4 sm:$0xff]   ;;  %v2285_v40 = vld [vmem:[%s3217_s0 + $0x2e0] ss:$8 sps:$4 sm:$0xff]  }
  0x6a   :  { %830 = vmatprep.mubr.bf16.mxu0 %v2190_v41  ;;  %1030 = vmatprep.mubr.bf16.mxu1 %v2192_v42  ;;  %v2286_v41 = vld [vmem:[%s3217_s0 + $0x164] ss:$8 sps:$4 sm:$0xff]   ;;  %v2288_v42 = vld [vmem:[%s3217_s0 + $0x2f4] ss:$8 sps:$4 sm:$0xff]  }
  0x71   :  { %831 = vmatmul.mubr.bf16.gmra.mrb[24].mxu0 %v2194_v43  ;;  %1031 = vmatmul.mubr.bf16.gmra.mrb[24].mxu1 %v2195_v44  ;;  %v2290_v43 = vld [vmem:[%s3217_s0 + $0x160] ss:$8 sps:$4 sm:$0xff]   ;;  %v2291_v44 = vld [vmem:[%s3217_s0 + $0x2f0] ss:$8 sps:$4 sm:$0xff]  }
  0x72   :  { %838 = vmatprep.mubr.bf16.mxu0 %v2196_v45  ;;  %1038 = vmatprep.mubr.bf16.mxu1 %v2198_v46  ;;  %v2292_v45 = vld [vmem:[%s3217_s0 + $0x174] ss:$8 sps:$4 sm:$0xff]   ;;  %v2294_v46 = vld [vmem:[%s3217_s0 + $0x304] ss:$8 sps:$4 sm:$0xff]  }
  0x79   :  { %839 = vmatmul.mubr.bf16.gmra.mrb[28].mxu0 %v2200_v47  ;;  %1039 = vmatmul.mubr.bf16.gmra.mrb[28].mxu1 %v2201_v48  ;;  %v2296_v47 = vld [vmem:[%s3217_s0 + $0x170] ss:$8 sps:$4 sm:$0xff]   ;;  %v2297_v48 = vld [vmem:[%s3217_s0 + $0x300] ss:$8 sps:$4 sm:$0xff]  }
  0x7a   :  { %846 = vmatprep.mubr.bf16.mxu0 %v2202_v49  ;;  %1046 = vmatprep.mubr.bf16.mxu1 %v2204_v50  ;;  %v2298_v49 = vld [vmem:[%s3217_s0 + $0x184] ss:$8 sps:$4 sm:$0xff]   ;;  %v2300_v50 = vld [vmem:[%s3217_s0 + $0x314] ss:$8 sps:$4 sm:$0xff]  }
  0x81   :  { %847 = vmatmul.mubr.bf16.gmra.mrb[32].mxu0 %v2206_v51  ;;  %1047 = vmatmul.mubr.bf16.gmra.mrb[32].mxu1 %v2207_v52  ;;  %v2302_v51 = vld [vmem:[%s3217_s0 + $0x180] ss:$8 sps:$4 sm:$0xff]   ;;  %v2303_v52 = vld [vmem:[%s3217_s0 + $0x310] ss:$8 sps:$4 sm:$0xff]  }
  0x82   :  { %854 = vmatprep.mubr.bf16.mxu0 %v2208_v53  ;;  %1054 = vmatprep.mubr.bf16.mxu1 %v2210_v54  ;;  %v2709_v53 = vld [vmem:[%s3218_s2] ss:$0 sm:$0xff] }
  0x89   :  { %855 = vmatmul.mubr.bf16.gmra.mrb[36].mxu0 %v2212_v55  ;;  %1055 = vmatmul.mubr.bf16.gmra.mrb[36].mxu1 %v2213_v56 }
  0x8a   :  { %862 = vmatprep.mubr.bf16.mxu0 %v2214_v57  ;;  %1062 = vmatprep.mubr.bf16.mxu1 %v2216_v58 }
  0x91   :  { %863 = vmatmul.mubr.bf16.gmra.mrb[40].mxu0 %v2218_v59  ;;  %1063 = vmatmul.mubr.bf16.gmra.mrb[40].mxu1 %v2219_v60 }
  0x92   :  { %870 = vmatprep.mubr.bf16.mxu0 %v2220_v61  ;;  %1070 = vmatprep.mubr.bf16.mxu1 %v2222_v62 }
  0x99   :  { %871 = vmatmul.mubr.bf16.gmra.mrb[44].mxu0 %v2224_v63  ;;  %1071 = vmatmul.mubr.bf16.gmra.mrb[44].mxu1 %v2225_v0 }
  0x9a   :  { %878 = vmatprep.mubr.bf16.mxu0 %v2226_v1  ;;  %1078 = vmatprep.mubr.bf16.mxu1 %v2228_v2 }
  0xa1   :  { %879 = vmatmul.mubr.bf16.gmra.mrb[48].mxu0 %v2230_v3  ;;  %1079 = vmatmul.mubr.bf16.gmra.mrb[48].mxu1 %v2231_v4 }
  0xa2   :  { %886 = vmatprep.mubr.bf16.mxu0 %v2232_v5  ;;  %1086 = vmatprep.mubr.bf16.mxu1 %v2234_v6 }
  0xa9   :  { %887 = vmatmul.mubr.bf16.gmra.mrb[52].mxu0 %v2236_v7  ;;  %1087 = vmatmul.mubr.bf16.gmra.mrb[52].mxu1 %v2237_v8 }
  0xaa   :  { %894 = vmatprep.mubr.bf16.mxu0 %v2238_v9  ;;  %1094 = vmatprep.mubr.bf16.mxu1 %v2240_v10 }
  0xb1   :  { %895 = vmatmul.mubr.bf16.gmra.mrb[56].mxu0 %v2242_v11  ;;  %1095 = vmatmul.mubr.bf16.gmra.mrb[56].mxu1 %v2243_v12 }
  0xb2   :  { %902 = vmatprep.mubr.bf16.mxu0 %v2244_v13  ;;  %1102 = vmatprep.mubr.bf16.mxu1 %v2246_v14 }
  0xb9   :  { %903 = vmatmul.mubr.bf16.gmra.mrb[60].mxu0 %v2248_v15  ;;  %1103 = vmatmul.mubr.bf16.gmra.mrb[60].mxu1 %v2249_v16 }
  0xba   :  { %910 = vmatprep.mubr.bf16.mxu0 %v2250_v17  ;;  %1110 = vmatprep.mubr.bf16.mxu1 %v2252_v18 }
  0xc1   :  { %911 = vmatmul.mubr.bf16.gmra.mrb[64].mxu0 %v2254_v19  ;;  %1111 = vmatmul.mubr.bf16.gmra.mrb[64].mxu1 %v2255_v20 }
  0xc2   :  { %918 = vmatprep.mubr.bf16.mxu0 %v2256_v21  ;;  %1118 = vmatprep.mubr.bf16.mxu1 %v2258_v22 }
  0xc9   :  { %919 = vmatmul.mubr.bf16.gmra.mrb[68].mxu0 %v2260_v23  ;;  %1119 = vmatmul.mubr.bf16.gmra.mrb[68].mxu1 %v2261_v24 }
  0xca   :  { %926 = vmatprep.mubr.bf16.mxu0 %v2262_v25  ;;  %1126 = vmatprep.mubr.bf16.mxu1 %v2264_v26 }
  0xd1   :  { %927 = vmatmul.mubr.bf16.gmra.mrb[72].mxu0 %v2266_v27  ;;  %1127 = vmatmul.mubr.bf16.gmra.mrb[72].mxu1 %v2267_v28 }
  0xd2   :  { %934 = vmatprep.mubr.bf16.mxu0 %v2268_v29  ;;  %1134 = vmatprep.mubr.bf16.mxu1 %v2270_v30 }
  0xd9   :  { %935 = vmatmul.mubr.bf16.gmra.mrb[76].mxu0 %v2272_v31  ;;  %1135 = vmatmul.mubr.bf16.gmra.mrb[76].mxu1 %v2273_v32 }
  0xda   :  { %942 = vmatprep.mubr.bf16.mxu0 %v2274_v33  ;;  %1142 = vmatprep.mubr.bf16.mxu1 %v2276_v34 }
  0xe1   :  { %943 = vmatmul.mubr.bf16.gmra.mrb[80].mxu0 %v2278_v35  ;;  %1143 = vmatmul.mubr.bf16.gmra.mrb[80].mxu1 %v2279_v36 }
  0xe2   :  { %950 = vmatprep.mubr.bf16.mxu0 %v2280_v37  ;;  %1150 = vmatprep.mubr.bf16.mxu1 %v2282_v38 }
  0xe9   :  { %951 = vmatmul.mubr.bf16.gmra.mrb[84].mxu0 %v2284_v39  ;;  %1151 = vmatmul.mubr.bf16.gmra.mrb[84].mxu1 %v2285_v40 }
  0xea   :  { %958 = vmatprep.mubr.bf16.mxu0 %v2286_v41  ;;  %1158 = vmatprep.mubr.bf16.mxu1 %v2288_v42 }
  0xf1   :  { %959 = vmatmul.mubr.bf16.gmra.mrb[88].mxu0 %v2290_v43  ;;  %1159 = vmatmul.mubr.bf16.gmra.mrb[88].mxu1 %v2291_v44 }
  0xf2   :  { %966 = vmatprep.mubr.bf16.mxu0 %v2292_v45  ;;  %1166 = vmatprep.mubr.bf16.mxu1 %v2294_v46 }
  0xf9   :  { %967 = vmatmul.mubr.bf16.gmra.mrb[92].mxu0 %v2296_v47  ;;  %1167 = vmatmul.mubr.bf16.gmra.mrb[92].mxu1 %v2297_v48 }
  0xfa   :  { %974 = vmatprep.mubr.bf16.mxu0 %v2298_v49  ;;  %1174 = vmatprep.mubr.bf16.mxu1 %v2300_v50 }
 0x101   :  { %975 = vmatmul.mubr.bf16.gmra.mrb[96].mxu0 %v2302_v51  ;;  %1175 = vmatmul.mubr.bf16.gmra.mrb[96].mxu1 %v2303_v52 }
 0x114   :  { %v784_v54 = vpop.f32.mrb[0].mxu0  ;;  %v984_v55 = vpop.f32.mrb[0].mxu1 }
 0x115   :  { %v785_v56 = vadd.f32 %v2709_v53, %v784_v54  ;;  %v985_v57 = vadd.f32 %v2709_v53, %v984_v55  ;;  %v786_v58 = vpop.f32.mrb[1].mxu0  ;;  %v986_v59 = vpop.f32.mrb[1].mxu1 }
 0x116   :  { %v787_v60 = vpop.f32.mrb[2].mxu0  ;;  %v987_v61 = vpop.f32.mrb[2].mxu1 }
 0x117   :  { %v1183_v62 = vmax.f32 %v785_v56, 0.0  ;;  %v1233_v63 = vmax.f32 %v985_v57, 0.0  ;;  %v788_v0 = vadd.f32 %v2709_v53, %v787_v60  ;;  %v988_v1 = vadd.f32 %v2709_v53, %v987_v61  ;;  %v789_v2 = vpop.f32.mrb[3].mxu0  ;;  %v989_v3 = vpop.f32.mrb[3].mxu1 }
 0x119   :  { %v2005_v4 = vpack.c.bf16 %v1183_v62, %v1183_v62  ;;  %v2055_v5 = vpack.c.bf16 %v1233_v63, %v1233_v63  ;;  %v1184_v6 = vmax.f32 %v788_v0, 0.0  ;;  %v1234_v7 = vmax.f32 %v988_v1, 0.0 }
 0x11b   :  { %1684 = vst.msk [vmem:[%s3219_s3] sm:$0xf] %vm1683_vm0, %v2005_v4  ;;  %1734 = vst.msk [vmem:[%s3219_s3 + $0xc8] sm:$0xf] %vm1683_vm0, %v2055_v5  ;;  %v2006_v8 = vpack.c.bf16 %v1184_v6, %v1184_v6  ;;  %v2056_v9 = vpack.c.bf16 %v1234_v7, %v1234_v7 }
 0x11c   :  { %v792_v10 = vpop.f32.mrb[4].mxu0  ;;  %v992_v11 = vpop.f32.mrb[4].mxu1 }
 0x11d   :  { %1685 = vst.msk [vmem:[%s3219_s3 + $0x4] sm:$0xf] %vm1683_vm0, %v2006_v8  ;;  %1735 = vst.msk [vmem:[%s3219_s3 + $0xcc] sm:$0xf] %vm1683_vm0, %v2056_v9  ;;  %v793_v12 = vadd.f32 %v2709_v53, %v792_v10  ;;  %v993_v13 = vadd.f32 %v2709_v53, %v992_v11  ;;  %v794_v14 = vpop.f32.mrb[5].mxu0  ;;  %v994_v15 = vpop.f32.mrb[5].mxu1 }
 0x11e   :  { %v795_v16 = vpop.f32.mrb[6].mxu0  ;;  %v995_v17 = vpop.f32.mrb[6].mxu1 }
 0x11f   :  { %v1185_v18 = vmax.f32 %v793_v12, 0.0  ;;  %v1235_v19 = vmax.f32 %v993_v13, 0.0  ;;  %v796_v20 = vadd.f32 %v2709_v53, %v795_v16  ;;  %v996_v21 = vadd.f32 %v2709_v53, %v995_v17  ;;  %v797_v22 = vpop.f32.mrb[7].mxu0  ;;  %v997_v23 = vpop.f32.mrb[7].mxu1 }
 0x121   :  { %v2007_v24 = vpack.c.bf16 %v1185_v18, %v1185_v18  ;;  %v2057_v25 = vpack.c.bf16 %v1235_v19, %v1235_v19  ;;  %v1186_v26 = vmax.f32 %v796_v20, 0.0  ;;  %v1236_v27 = vmax.f32 %v996_v21, 0.0 }
 0x123   :  { %1686 = vst.msk [vmem:[%s3219_s3 + $0x8] sm:$0xf] %vm1683_vm0, %v2007_v24  ;;  %1736 = vst.msk [vmem:[%s3219_s3 + $0xd0] sm:$0xf] %vm1683_vm0, %v2057_v25  ;;  %v2008_v28 = vpack.c.bf16 %v1186_v26, %v1186_v26  ;;  %v2058_v29 = vpack.c.bf16 %v1236_v27, %v1236_v27 }
 0x124   :  { %v800_v30 = vpop.f32.mrb[8].mxu0  ;;  %v1000_v31 = vpop.f32.mrb[8].mxu1 }
 0x125   :  { %1687 = vst.msk [vmem:[%s3219_s3 + $0xc] sm:$0xf] %vm1683_vm0, %v2008_v28  ;;  %1737 = vst.msk [vmem:[%s3219_s3 + $0xd4] sm:$0xf] %vm1683_vm0, %v2058_v29  ;;  %v801_v32 = vadd.f32 %v2709_v53, %v800_v30  ;;  %v1001_v33 = vadd.f32 %v2709_v53, %v1000_v31  ;;  %v802_v34 = vpop.f32.mrb[9].mxu0  ;;  %v1002_v35 = vpop.f32.mrb[9].mxu1 }
 0x126   :  { %v803_v36 = vpop.f32.mrb[10].mxu0  ;;  %v1003_v37 = vpop.f32.mrb[10].mxu1 }
 0x127   :  { %v1187_v38 = vmax.f32 %v801_v32, 0.0  ;;  %v1237_v39 = vmax.f32 %v1001_v33, 0.0  ;;  %v804_v40 = vadd.f32 %v2709_v53, %v803_v36  ;;  %v1004_v41 = vadd.f32 %v2709_v53, %v1003_v37  ;;  %v805_v42 = vpop.f32.mrb[11].mxu0  ;;  %v1005_v43 = vpop.f32.mrb[11].mxu1 }
 0x129   :  { %v2009_v44 = vpack.c.bf16 %v1187_v38, %v1187_v38  ;;  %v2059_v45 = vpack.c.bf16 %v1237_v39, %v1237_v39  ;;  %v1188_v46 = vmax.f32 %v804_v40, 0.0  ;;  %v1238_v47 = vmax.f32 %v1004_v41, 0.0 }
 0x12b   :  { %1688 = vst.msk [vmem:[%s3219_s3 + $0x10] sm:$0xf] %vm1683_vm0, %v2009_v44  ;;  %1738 = vst.msk [vmem:[%s3219_s3 + $0xd8] sm:$0xf] %vm1683_vm0, %v2059_v45  ;;  %v2010_v48 = vpack.c.bf16 %v1188_v46, %v1188_v46  ;;  %v2060_v49 = vpack.c.bf16 %v1238_v47, %v1238_v47 }
 0x12c   :  { %v808_v50 = vpop.f32.mrb[12].mxu0  ;;  %v1008_v51 = vpop.f32.mrb[12].mxu1 }
 0x12d   :  { %1689 = vst.msk [vmem:[%s3219_s3 + $0x14] sm:$0xf] %vm1683_vm0, %v2010_v48  ;;  %1739 = vst.msk [vmem:[%s3219_s3 + $0xdc] sm:$0xf] %vm1683_vm0, %v2060_v49  ;;  %v809_v52 = vadd.f32 %v2709_v53, %v808_v50  ;;  %v1009_v54 = vadd.f32 %v2709_v53, %v1008_v51  ;;  %v810_v55 = vpop.f32.mrb[13].mxu0  ;;  %v1010_v56 = vpop.f32.mrb[13].mxu1 }
 0x12e   :  { %v811_v57 = vpop.f32.mrb[14].mxu0  ;;  %v1011_v58 = vpop.f32.mrb[14].mxu1 }
 0x12f   :  { %v1189_v59 = vmax.f32 %v809_v52, 0.0  ;;  %v1239_v60 = vmax.f32 %v1009_v54, 0.0  ;;  %v812_v61 = vadd.f32 %v2709_v53, %v811_v57  ;;  %v1012_v62 = vadd.f32 %v2709_v53, %v1011_v58  ;;  %v813_v63 = vpop.f32.mrb[15].mxu0  ;;  %v1013_v0 = vpop.f32.mrb[15].mxu1 }
 0x131   :  { %v2011_v1 = vpack.c.bf16 %v1189_v59, %v1189_v59  ;;  %v2061_v2 = vpack.c.bf16 %v1239_v60, %v1239_v60  ;;  %v1190_v3 = vmax.f32 %v812_v61, 0.0  ;;  %v1240_v4 = vmax.f32 %v1012_v62, 0.0 }
 0x133   :  { %1690 = vst.msk [vmem:[%s3219_s3 + $0x18] sm:$0xf] %vm1683_vm0, %v2011_v1  ;;  %1740 = vst.msk [vmem:[%s3219_s3 + $0xe0] sm:$0xf] %vm1683_vm0, %v2061_v2  ;;  %v2012_v5 = vpack.c.bf16 %v1190_v3, %v1190_v3  ;;  %v2062_v6 = vpack.c.bf16 %v1240_v4, %v1240_v4 }
 0x134   :  { %v816_v7 = vpop.f32.mrb[16].mxu0  ;;  %v1016_v8 = vpop.f32.mrb[16].mxu1 }
 0x135   :  { %1691 = vst.msk [vmem:[%s3219_s3 + $0x1c] sm:$0xf] %vm1683_vm0, %v2012_v5  ;;  %1741 = vst.msk [vmem:[%s3219_s3 + $0xe4] sm:$0xf] %vm1683_vm0, %v2062_v6  ;;  %v817_v9 = vadd.f32 %v2709_v53, %v816_v7  ;;  %v1017_v10 = vadd.f32 %v2709_v53, %v1016_v8  ;;  %v818_v11 = vpop.f32.mrb[17].mxu0  ;;  %v1018_v12 = vpop.f32.mrb[17].mxu1 }
 0x136   :  { %v819_v13 = vpop.f32.mrb[18].mxu0  ;;  %v1019_v14 = vpop.f32.mrb[18].mxu1 }
 0x137   :  { %v1191_v15 = vmax.f32 %v817_v9, 0.0  ;;  %v1241_v16 = vmax.f32 %v1017_v10, 0.0  ;;  %v820_v17 = vadd.f32 %v2709_v53, %v819_v13  ;;  %v1020_v18 = vadd.f32 %v2709_v53, %v1019_v14  ;;  %v821_v19 = vpop.f32.mrb[19].mxu0  ;;  %v1021_v20 = vpop.f32.mrb[19].mxu1 }
 0x139   :  { %v2013_v21 = vpack.c.bf16 %v1191_v15, %v1191_v15  ;;  %v2063_v22 = vpack.c.bf16 %v1241_v16, %v1241_v16  ;;  %v1192_v23 = vmax.f32 %v820_v17, 0.0  ;;  %v1242_v24 = vmax.f32 %v1020_v18, 0.0 }
 0x13b   :  { %1692 = vst.msk [vmem:[%s3219_s3 + $0x20] sm:$0xf] %vm1683_vm0, %v2013_v21  ;;  %1742 = vst.msk [vmem:[%s3219_s3 + $0xe8] sm:$0xf] %vm1683_vm0, %v2063_v22  ;;  %v2014_v25 = vpack.c.bf16 %v1192_v23, %v1192_v23  ;;  %v2064_v26 = vpack.c.bf16 %v1242_v24, %v1242_v24 }
 0x13c   :  { %v824_v27 = vpop.f32.mrb[20].mxu0  ;;  %v1024_v28 = vpop.f32.mrb[20].mxu1 }
 0x13d   :  { %1693 = vst.msk [vmem:[%s3219_s3 + $0x24] sm:$0xf] %vm1683_vm0, %v2014_v25  ;;  %1743 = vst.msk [vmem:[%s3219_s3 + $0xec] sm:$0xf] %vm1683_vm0, %v2064_v26  ;;  %v825_v29 = vadd.f32 %v2709_v53, %v824_v27  ;;  %v1025_v30 = vadd.f32 %v2709_v53, %v1024_v28  ;;  %v826_v31 = vpop.f32.mrb[21].mxu0  ;;  %v1026_v32 = vpop.f32.mrb[21].mxu1 }
 0x13e   :  { %v827_v33 = vpop.f32.mrb[22].mxu0  ;;  %v1027_v34 = vpop.f32.mrb[22].mxu1 }
 0x13f   :  { %v1193_v35 = vmax.f32 %v825_v29, 0.0  ;;  %v1243_v36 = vmax.f32 %v1025_v30, 0.0  ;;  %v828_v37 = vadd.f32 %v2709_v53, %v827_v33  ;;  %v1028_v38 = vadd.f32 %v2709_v53, %v1027_v34  ;;  %v829_v39 = vpop.f32.mrb[23].mxu0  ;;  %v1029_v40 = vpop.f32.mrb[23].mxu1 }
 0x141   :  { %v2015_v41 = vpack.c.bf16 %v1193_v35, %v1193_v35  ;;  %v2065_v42 = vpack.c.bf16 %v1243_v36, %v1243_v36  ;;  %v1194_v43 = vmax.f32 %v828_v37, 0.0  ;;  %v1244_v44 = vmax.f32 %v1028_v38, 0.0 }
 0x143   :  { %1694 = vst.msk [vmem:[%s3219_s3 + $0x28] sm:$0xf] %vm1683_vm0, %v2015_v41  ;;  %1744 = vst.msk [vmem:[%s3219_s3 + $0xf0] sm:$0xf] %vm1683_vm0, %v2065_v42  ;;  %v2016_v45 = vpack.c.bf16 %v1194_v43, %v1194_v43  ;;  %v2066_v46 = vpack.c.bf16 %v1244_v44, %v1244_v44 }
 0x144   :  { %v832_v47 = vpop.f32.mrb[24].mxu0  ;;  %v1032_v48 = vpop.f32.mrb[24].mxu1 }
 0x145   :  { %1695 = vst.msk [vmem:[%s3219_s3 + $0x2c] sm:$0xf] %vm1683_vm0, %v2016_v45  ;;  %1745 = vst.msk [vmem:[%s3219_s3 + $0xf4] sm:$0xf] %vm1683_vm0, %v2066_v46  ;;  %v833_v49 = vadd.f32 %v2709_v53, %v832_v47  ;;  %v1033_v50 = vadd.f32 %v2709_v53, %v1032_v48  ;;  %v834_v51 = vpop.f32.mrb[25].mxu0  ;;  %v1034_v52 = vpop.f32.mrb[25].mxu1 }
 0x146   :  { %v835_v54 = vpop.f32.mrb[26].mxu0  ;;  %v1035_v55 = vpop.f32.mrb[26].mxu1 }
 0x147   :  { %v1195_v56 = vmax.f32 %v833_v49, 0.0  ;;  %v1245_v57 = vmax.f32 %v1033_v50, 0.0  ;;  %v836_v58 = vadd.f32 %v2709_v53, %v835_v54  ;;  %v1036_v59 = vadd.f32 %v2709_v53, %v1035_v55  ;;  %v837_v60 = vpop.f32.mrb[27].mxu0  ;;  %v1037_v61 = vpop.f32.mrb[27].mxu1 }
 0x149   :  { %v2017_v62 = vpack.c.bf16 %v1195_v56, %v1195_v56  ;;  %v2067_v63 = vpack.c.bf16 %v1245_v57, %v1245_v57  ;;  %v1196_v0 = vmax.f32 %v836_v58, 0.0  ;;  %v1246_v1 = vmax.f32 %v1036_v59, 0.0 }
 0x14b   :  { %1696 = vst.msk [vmem:[%s3219_s3 + $0x30] sm:$0xf] %vm1683_vm0, %v2017_v62  ;;  %1746 = vst.msk [vmem:[%s3219_s3 + $0xf8] sm:$0xf] %vm1683_vm0, %v2067_v63  ;;  %v2018_v2 = vpack.c.bf16 %v1196_v0, %v1196_v0  ;;  %v2068_v3 = vpack.c.bf16 %v1246_v1, %v1246_v1 }
 0x14c   :  { %v840_v4 = vpop.f32.mrb[28].mxu0  ;;  %v1040_v5 = vpop.f32.mrb[28].mxu1 }
 0x14d   :  { %1697 = vst.msk [vmem:[%s3219_s3 + $0x34] sm:$0xf] %vm1683_vm0, %v2018_v2  ;;  %1747 = vst.msk [vmem:[%s3219_s3 + $0xfc] sm:$0xf] %vm1683_vm0, %v2068_v3  ;;  %v841_v6 = vadd.f32 %v2709_v53, %v840_v4  ;;  %v1041_v7 = vadd.f32 %v2709_v53, %v1040_v5  ;;  %v842_v8 = vpop.f32.mrb[29].mxu0  ;;  %v1042_v9 = vpop.f32.mrb[29].mxu1 }
 0x14e   :  { %v843_v10 = vpop.f32.mrb[30].mxu0  ;;  %v1043_v11 = vpop.f32.mrb[30].mxu1 }
 0x14f   :  { %v1197_v12 = vmax.f32 %v841_v6, 0.0  ;;  %v1247_v13 = vmax.f32 %v1041_v7, 0.0  ;;  %v844_v14 = vadd.f32 %v2709_v53, %v843_v10  ;;  %v1044_v15 = vadd.f32 %v2709_v53, %v1043_v11  ;;  %v845_v16 = vpop.f32.mrb[31].mxu0  ;;  %v1045_v17 = vpop.f32.mrb[31].mxu1 }
 0x151   :  { %v2019_v18 = vpack.c.bf16 %v1197_v12, %v1197_v12  ;;  %v2069_v19 = vpack.c.bf16 %v1247_v13, %v1247_v13  ;;  %v1198_v20 = vmax.f32 %v844_v14, 0.0  ;;  %v1248_v21 = vmax.f32 %v1044_v15, 0.0 }
 0x153   :  { %1698 = vst.msk [vmem:[%s3219_s3 + $0x38] sm:$0xf] %vm1683_vm0, %v2019_v18  ;;  %1748 = vst.msk [vmem:[%s3219_s3 + $0x100] sm:$0xf] %vm1683_vm0, %v2069_v19  ;;  %v2020_v22 = vpack.c.bf16 %v1198_v20, %v1198_v20  ;;  %v2070_v23 = vpack.c.bf16 %v1248_v21, %v1248_v21 }
 0x154   :  { %v848_v24 = vpop.f32.mrb[32].mxu0  ;;  %v1048_v25 = vpop.f32.mrb[32].mxu1 }
 0x155   :  { %1699 = vst.msk [vmem:[%s3219_s3 + $0x3c] sm:$0xf] %vm1683_vm0, %v2020_v22  ;;  %1749 = vst.msk [vmem:[%s3219_s3 + $0x104] sm:$0xf] %vm1683_vm0, %v2070_v23  ;;  %v849_v26 = vadd.f32 %v2709_v53, %v848_v24  ;;  %v1049_v27 = vadd.f32 %v2709_v53, %v1048_v25  ;;  %v850_v28 = vpop.f32.mrb[33].mxu0  ;;  %v1050_v29 = vpop.f32.mrb[33].mxu1 }
 0x156   :  { %v851_v30 = vpop.f32.mrb[34].mxu0  ;;  %v1051_v31 = vpop.f32.mrb[34].mxu1 }
 0x157   :  { %v1199_v32 = vmax.f32 %v849_v26, 0.0  ;;  %v1249_v33 = vmax.f32 %v1049_v27, 0.0  ;;  %v852_v34 = vadd.f32 %v2709_v53, %v851_v30  ;;  %v1052_v35 = vadd.f32 %v2709_v53, %v1051_v31  ;;  %v853_v36 = vpop.f32.mrb[35].mxu0  ;;  %v1053_v37 = vpop.f32.mrb[35].mxu1 }
 0x159   :  { %v2021_v38 = vpack.c.bf16 %v1199_v32, %v1199_v32  ;;  %v2071_v39 = vpack.c.bf16 %v1249_v33, %v1249_v33  ;;  %v1200_v40 = vmax.f32 %v852_v34, 0.0  ;;  %v1250_v41 = vmax.f32 %v1052_v35, 0.0 }
 0x15b   :  { %1700 = vst.msk [vmem:[%s3219_s3 + $0x40] sm:$0xf] %vm1683_vm0, %v2021_v38  ;;  %1750 = vst.msk [vmem:[%s3219_s3 + $0x108] sm:$0xf] %vm1683_vm0, %v2071_v39  ;;  %v2022_v42 = vpack.c.bf16 %v1200_v40, %v1200_v40  ;;  %v2072_v43 = vpack.c.bf16 %v1250_v41, %v1250_v41 }
 0x15c   :  { %v856_v44 = vpop.f32.mrb[36].mxu0  ;;  %v1056_v45 = vpop.f32.mrb[36].mxu1 }
 0x15d   :  { %1701 = vst.msk [vmem:[%s3219_s3 + $0x44] sm:$0xf] %vm1683_vm0, %v2022_v42  ;;  %1751 = vst.msk [vmem:[%s3219_s3 + $0x10c] sm:$0xf] %vm1683_vm0, %v2072_v43  ;;  %v857_v46 = vadd.f32 %v2709_v53, %v856_v44  ;;  %v1057_v47 = vadd.f32 %v2709_v53, %v1056_v45  ;;  %v858_v48 = vpop.f32.mrb[37].mxu0  ;;  %v1058_v49 = vpop.f32.mrb[37].mxu1 }
 0x15e   :  { %v859_v50 = vpop.f32.mrb[38].mxu0  ;;  %v1059_v51 = vpop.f32.mrb[38].mxu1 }
 0x15f   :  { %v1201_v52 = vmax.f32 %v857_v46, 0.0  ;;  %v1251_v54 = vmax.f32 %v1057_v47, 0.0  ;;  %v860_v55 = vadd.f32 %v2709_v53, %v859_v50  ;;  %v1060_v56 = vadd.f32 %v2709_v53, %v1059_v51  ;;  %v861_v57 = vpop.f32.mrb[39].mxu0  ;;  %v1061_v58 = vpop.f32.mrb[39].mxu1 }
 0x161   :  { %v2023_v59 = vpack.c.bf16 %v1201_v52, %v1201_v52  ;;  %v2073_v60 = vpack.c.bf16 %v1251_v54, %v1251_v54  ;;  %v1202_v61 = vmax.f32 %v860_v55, 0.0  ;;  %v1252_v62 = vmax.f32 %v1060_v56, 0.0 }
 0x163   :  { %1702 = vst.msk [vmem:[%s3219_s3 + $0x48] sm:$0xf] %vm1683_vm0, %v2023_v59  ;;  %1752 = vst.msk [vmem:[%s3219_s3 + $0x110] sm:$0xf] %vm1683_vm0, %v2073_v60  ;;  %v2024_v63 = vpack.c.bf16 %v1202_v61, %v1202_v61  ;;  %v2074_v0 = vpack.c.bf16 %v1252_v62, %v1252_v62 }
 0x164   :  { %v864_v1 = vpop.f32.mrb[40].mxu0  ;;  %v1064_v2 = vpop.f32.mrb[40].mxu1 }
 0x165   :  { %1703 = vst.msk [vmem:[%s3219_s3 + $0x4c] sm:$0xf] %vm1683_vm0, %v2024_v63  ;;  %1753 = vst.msk [vmem:[%s3219_s3 + $0x114] sm:$0xf] %vm1683_vm0, %v2074_v0  ;;  %v865_v3 = vadd.f32 %v2709_v53, %v864_v1  ;;  %v1065_v4 = vadd.f32 %v2709_v53, %v1064_v2  ;;  %v866_v5 = vpop.f32.mrb[41].mxu0  ;;  %v1066_v6 = vpop.f32.mrb[41].mxu1 }
 0x166   :  { %v867_v7 = vpop.f32.mrb[42].mxu0  ;;  %v1067_v8 = vpop.f32.mrb[42].mxu1 }
 0x167   :  { %v1203_v9 = vmax.f32 %v865_v3, 0.0  ;;  %v1253_v10 = vmax.f32 %v1065_v4, 0.0  ;;  %v868_v11 = vadd.f32 %v2709_v53, %v867_v7  ;;  %v1068_v12 = vadd.f32 %v2709_v53, %v1067_v8  ;;  %v869_v13 = vpop.f32.mrb[43].mxu0  ;;  %v1069_v14 = vpop.f32.mrb[43].mxu1 }
 0x169   :  { %v2025_v15 = vpack.c.bf16 %v1203_v9, %v1203_v9  ;;  %v2075_v16 = vpack.c.bf16 %v1253_v10, %v1253_v10  ;;  %v1204_v17 = vmax.f32 %v868_v11, 0.0  ;;  %v1254_v18 = vmax.f32 %v1068_v12, 0.0 }
 0x16b   :  { %1704 = vst.msk [vmem:[%s3219_s3 + $0x50] sm:$0xf] %vm1683_vm0, %v2025_v15  ;;  %1754 = vst.msk [vmem:[%s3219_s3 + $0x118] sm:$0xf] %vm1683_vm0, %v2075_v16  ;;  %v2026_v19 = vpack.c.bf16 %v1204_v17, %v1204_v17  ;;  %v2076_v20 = vpack.c.bf16 %v1254_v18, %v1254_v18 }
 0x16c   :  { %v872_v21 = vpop.f32.mrb[44].mxu0  ;;  %v1072_v22 = vpop.f32.mrb[44].mxu1 }
 0x16d   :  { %1705 = vst.msk [vmem:[%s3219_s3 + $0x54] sm:$0xf] %vm1683_vm0, %v2026_v19  ;;  %1755 = vst.msk [vmem:[%s3219_s3 + $0x11c] sm:$0xf] %vm1683_vm0, %v2076_v20  ;;  %v873_v23 = vadd.f32 %v2709_v53, %v872_v21  ;;  %v1073_v24 = vadd.f32 %v2709_v53, %v1072_v22  ;;  %v874_v25 = vpop.f32.mrb[45].mxu0  ;;  %v1074_v26 = vpop.f32.mrb[45].mxu1 }
 0x16e   :  { %v875_v27 = vpop.f32.mrb[46].mxu0  ;;  %v1075_v28 = vpop.f32.mrb[46].mxu1 }
 0x16f   :  { %v1205_v29 = vmax.f32 %v873_v23, 0.0  ;;  %v1255_v30 = vmax.f32 %v1073_v24, 0.0  ;;  %v876_v31 = vadd.f32 %v2709_v53, %v875_v27  ;;  %v1076_v32 = vadd.f32 %v2709_v53, %v1075_v28  ;;  %v877_v33 = vpop.f32.mrb[47].mxu0  ;;  %v1077_v34 = vpop.f32.mrb[47].mxu1 }
 0x171   :  { %v2027_v35 = vpack.c.bf16 %v1205_v29, %v1205_v29  ;;  %v2077_v36 = vpack.c.bf16 %v1255_v30, %v1255_v30  ;;  %v1206_v37 = vmax.f32 %v876_v31, 0.0  ;;  %v1256_v38 = vmax.f32 %v1076_v32, 0.0 }
 0x173   :  { %1706 = vst.msk [vmem:[%s3219_s3 + $0x58] sm:$0xf] %vm1683_vm0, %v2027_v35  ;;  %1756 = vst.msk [vmem:[%s3219_s3 + $0x120] sm:$0xf] %vm1683_vm0, %v2077_v36  ;;  %v2028_v39 = vpack.c.bf16 %v1206_v37, %v1206_v37  ;;  %v2078_v40 = vpack.c.bf16 %v1256_v38, %v1256_v38 }
 0x174   :  { %v880_v41 = vpop.f32.mrb[48].mxu0  ;;  %v1080_v42 = vpop.f32.mrb[48].mxu1 }
 0x175   :  { %1707 = vst.msk [vmem:[%s3219_s3 + $0x5c] sm:$0xf] %vm1683_vm0, %v2028_v39  ;;  %1757 = vst.msk [vmem:[%s3219_s3 + $0x124] sm:$0xf] %vm1683_vm0, %v2078_v40  ;;  %v881_v43 = vadd.f32 %v2709_v53, %v880_v41  ;;  %v1081_v44 = vadd.f32 %v2709_v53, %v1080_v42  ;;  %v882_v45 = vpop.f32.mrb[49].mxu0  ;;  %v1082_v46 = vpop.f32.mrb[49].mxu1 }
 0x176   :  { %v883_v47 = vpop.f32.mrb[50].mxu0  ;;  %v1083_v48 = vpop.f32.mrb[50].mxu1 }
 0x177   :  { %v1207_v49 = vmax.f32 %v881_v43, 0.0  ;;  %v1257_v50 = vmax.f32 %v1081_v44, 0.0  ;;  %v884_v51 = vadd.f32 %v2709_v53, %v883_v47  ;;  %v1084_v52 = vadd.f32 %v2709_v53, %v1083_v48  ;;  %v885_v54 = vpop.f32.mrb[51].mxu0  ;;  %v1085_v55 = vpop.f32.mrb[51].mxu1 }
 0x179   :  { %v2029_v56 = vpack.c.bf16 %v1207_v49, %v1207_v49  ;;  %v2079_v57 = vpack.c.bf16 %v1257_v50, %v1257_v50  ;;  %v1208_v58 = vmax.f32 %v884_v51, 0.0  ;;  %v1258_v59 = vmax.f32 %v1084_v52, 0.0 }
 0x17b   :  { %1708 = vst.msk [vmem:[%s3219_s3 + $0x60] sm:$0xf] %vm1683_vm0, %v2029_v56  ;;  %1758 = vst.msk [vmem:[%s3219_s3 + $0x128] sm:$0xf] %vm1683_vm0, %v2079_v57  ;;  %v2030_v60 = vpack.c.bf16 %v1208_v58, %v1208_v58  ;;  %v2080_v61 = vpack.c.bf16 %v1258_v59, %v1258_v59 }
 0x17c   :  { %v888_v62 = vpop.f32.mrb[52].mxu0  ;;  %v1088_v63 = vpop.f32.mrb[52].mxu1 }
 0x17d   :  { %1709 = vst.msk [vmem:[%s3219_s3 + $0x64] sm:$0xf] %vm1683_vm0, %v2030_v60  ;;  %1759 = vst.msk [vmem:[%s3219_s3 + $0x12c] sm:$0xf] %vm1683_vm0, %v2080_v61  ;;  %v889_v0 = vadd.f32 %v2709_v53, %v888_v62  ;;  %v1089_v1 = vadd.f32 %v2709_v53, %v1088_v63  ;;  %v890_v2 = vpop.f32.mrb[53].mxu0  ;;  %v1090_v3 = vpop.f32.mrb[53].mxu1 }
 0x17e   :  { %v891_v4 = vpop.f32.mrb[54].mxu0  ;;  %v1091_v5 = vpop.f32.mrb[54].mxu1 }
 0x17f   :  { %v1209_v6 = vmax.f32 %v889_v0, 0.0  ;;  %v1259_v7 = vmax.f32 %v1089_v1, 0.0  ;;  %v892_v8 = vadd.f32 %v2709_v53, %v891_v4  ;;  %v1092_v9 = vadd.f32 %v2709_v53, %v1091_v5  ;;  %v893_v10 = vpop.f32.mrb[55].mxu0  ;;  %v1093_v11 = vpop.f32.mrb[55].mxu1 }
 0x181   :  { %v2031_v12 = vpack.c.bf16 %v1209_v6, %v1209_v6  ;;  %v2081_v13 = vpack.c.bf16 %v1259_v7, %v1259_v7  ;;  %v1210_v14 = vmax.f32 %v892_v8, 0.0  ;;  %v1260_v15 = vmax.f32 %v1092_v9, 0.0 }
 0x183   :  { %1710 = vst.msk [vmem:[%s3219_s3 + $0x68] sm:$0xf] %vm1683_vm0, %v2031_v12  ;;  %1760 = vst.msk [vmem:[%s3219_s3 + $0x130] sm:$0xf] %vm1683_vm0, %v2081_v13  ;;  %v2032_v16 = vpack.c.bf16 %v1210_v14, %v1210_v14  ;;  %v2082_v17 = vpack.c.bf16 %v1260_v15, %v1260_v15 }
 0x184   :  { %v896_v18 = vpop.f32.mrb[56].mxu0  ;;  %v1096_v19 = vpop.f32.mrb[56].mxu1 }
 0x185   :  { %1711 = vst.msk [vmem:[%s3219_s3 + $0x6c] sm:$0xf] %vm1683_vm0, %v2032_v16  ;;  %1761 = vst.msk [vmem:[%s3219_s3 + $0x134] sm:$0xf] %vm1683_vm0, %v2082_v17  ;;  %v897_v20 = vadd.f32 %v2709_v53, %v896_v18  ;;  %v1097_v21 = vadd.f32 %v2709_v53, %v1096_v19  ;;  %v898_v22 = vpop.f32.mrb[57].mxu0  ;;  %v1098_v23 = vpop.f32.mrb[57].mxu1 }
 0x186   :  { %v899_v24 = vpop.f32.mrb[58].mxu0  ;;  %v1099_v25 = vpop.f32.mrb[58].mxu1 }
 0x187   :  { %v1211_v26 = vmax.f32 %v897_v20, 0.0  ;;  %v1261_v27 = vmax.f32 %v1097_v21, 0.0  ;;  %v900_v28 = vadd.f32 %v2709_v53, %v899_v24  ;;  %v1100_v29 = vadd.f32 %v2709_v53, %v1099_v25  ;;  %v901_v30 = vpop.f32.mrb[59].mxu0  ;;  %v1101_v31 = vpop.f32.mrb[59].mxu1 }
 0x189   :  { %v2033_v32 = vpack.c.bf16 %v1211_v26, %v1211_v26  ;;  %v2083_v33 = vpack.c.bf16 %v1261_v27, %v1261_v27  ;;  %v1212_v34 = vmax.f32 %v900_v28, 0.0  ;;  %v1262_v35 = vmax.f32 %v1100_v29, 0.0 }
 0x18b   :  { %1712 = vst.msk [vmem:[%s3219_s3 + $0x70] sm:$0xf] %vm1683_vm0, %v2033_v32  ;;  %1762 = vst.msk [vmem:[%s3219_s3 + $0x138] sm:$0xf] %vm1683_vm0, %v2083_v33  ;;  %v2034_v36 = vpack.c.bf16 %v1212_v34, %v1212_v34  ;;  %v2084_v37 = vpack.c.bf16 %v1262_v35, %v1262_v35 }
 0x18c   :  { %v904_v38 = vpop.f32.mrb[60].mxu0  ;;  %v1104_v39 = vpop.f32.mrb[60].mxu1 }
 0x18d   :  { %1713 = vst.msk [vmem:[%s3219_s3 + $0x74] sm:$0xf] %vm1683_vm0, %v2034_v36  ;;  %1763 = vst.msk [vmem:[%s3219_s3 + $0x13c] sm:$0xf] %vm1683_vm0, %v2084_v37  ;;  %v905_v40 = vadd.f32 %v2709_v53, %v904_v38  ;;  %v1105_v41 = vadd.f32 %v2709_v53, %v1104_v39  ;;  %v906_v42 = vpop.f32.mrb[61].mxu0  ;;  %v1106_v43 = vpop.f32.mrb[61].mxu1 }
 0x18e   :  { %v907_v44 = vpop.f32.mrb[62].mxu0  ;;  %v1107_v45 = vpop.f32.mrb[62].mxu1 }
 0x18f   :  { %v1213_v46 = vmax.f32 %v905_v40, 0.0  ;;  %v1263_v47 = vmax.f32 %v1105_v41, 0.0  ;;  %v908_v48 = vadd.f32 %v2709_v53, %v907_v44  ;;  %v1108_v49 = vadd.f32 %v2709_v53, %v1107_v45  ;;  %v909_v50 = vpop.f32.mrb[63].mxu0  ;;  %v1109_v51 = vpop.f32.mrb[63].mxu1 }
 0x191   :  { %v2035_v52 = vpack.c.bf16 %v1213_v46, %v1213_v46  ;;  %v2085_v54 = vpack.c.bf16 %v1263_v47, %v1263_v47  ;;  %v1214_v55 = vmax.f32 %v908_v48, 0.0  ;;  %v1264_v56 = vmax.f32 %v1108_v49, 0.0 }
 0x193   :  { %1714 = vst.msk [vmem:[%s3219_s3 + $0x78] sm:$0xf] %vm1683_vm0, %v2035_v52  ;;  %1764 = vst.msk [vmem:[%s3219_s3 + $0x140] sm:$0xf] %vm1683_vm0, %v2085_v54  ;;  %v2036_v57 = vpack.c.bf16 %v1214_v55, %v1214_v55  ;;  %v2086_v58 = vpack.c.bf16 %v1264_v56, %v1264_v56 }
 0x194   :  { %v912_v59 = vpop.f32.mrb[64].mxu0  ;;  %v1112_v60 = vpop.f32.mrb[64].mxu1 }
 0x195   :  { %1715 = vst.msk [vmem:[%s3219_s3 + $0x7c] sm:$0xf] %vm1683_vm0, %v2036_v57  ;;  %1765 = vst.msk [vmem:[%s3219_s3 + $0x144] sm:$0xf] %vm1683_vm0, %v2086_v58  ;;  %v913_v61 = vadd.f32 %v2709_v53, %v912_v59  ;;  %v1113_v62 = vadd.f32 %v2709_v53, %v1112_v60  ;;  %v914_v63 = vpop.f32.mrb[65].mxu0  ;;  %v1114_v0 = vpop.f32.mrb[65].mxu1 }
 0x196   :  { %v915_v1 = vpop.f32.mrb[66].mxu0  ;;  %v1115_v2 = vpop.f32.mrb[66].mxu1 }
 0x197   :  { %v1215_v3 = vmax.f32 %v913_v61, 0.0  ;;  %v1265_v4 = vmax.f32 %v1113_v62, 0.0  ;;  %v916_v5 = vadd.f32 %v2709_v53, %v915_v1  ;;  %v1116_v6 = vadd.f32 %v2709_v53, %v1115_v2  ;;  %v917_v7 = vpop.f32.mrb[67].mxu0  ;;  %v1117_v8 = vpop.f32.mrb[67].mxu1 }
 0x199   :  { %v2037_v9 = vpack.c.bf16 %v1215_v3, %v1215_v3  ;;  %v2087_v10 = vpack.c.bf16 %v1265_v4, %v1265_v4  ;;  %v1216_v11 = vmax.f32 %v916_v5, 0.0  ;;  %v1266_v12 = vmax.f32 %v1116_v6, 0.0 }
 0x19b   :  { %1716 = vst.msk [vmem:[%s3219_s3 + $0x80] sm:$0xf] %vm1683_vm0, %v2037_v9  ;;  %1766 = vst.msk [vmem:[%s3219_s3 + $0x148] sm:$0xf] %vm1683_vm0, %v2087_v10  ;;  %v2038_v13 = vpack.c.bf16 %v1216_v11, %v1216_v11  ;;  %v2088_v14 = vpack.c.bf16 %v1266_v12, %v1266_v12 }
 0x19c   :  { %v920_v15 = vpop.f32.mrb[68].mxu0  ;;  %v1120_v16 = vpop.f32.mrb[68].mxu1 }
 0x19d   :  { %1717 = vst.msk [vmem:[%s3219_s3 + $0x84] sm:$0xf] %vm1683_vm0, %v2038_v13  ;;  %1767 = vst.msk [vmem:[%s3219_s3 + $0x14c] sm:$0xf] %vm1683_vm0, %v2088_v14  ;;  %v921_v17 = vadd.f32 %v2709_v53, %v920_v15  ;;  %v1121_v18 = vadd.f32 %v2709_v53, %v1120_v16  ;;  %v922_v19 = vpop.f32.mrb[69].mxu0  ;;  %v1122_v20 = vpop.f32.mrb[69].mxu1 }
 0x19e   :  { %v923_v21 = vpop.f32.mrb[70].mxu0  ;;  %v1123_v22 = vpop.f32.mrb[70].mxu1 }
 0x19f   :  { %v1217_v23 = vmax.f32 %v921_v17, 0.0  ;;  %v1267_v24 = vmax.f32 %v1121_v18, 0.0  ;;  %v924_v25 = vadd.f32 %v2709_v53, %v923_v21  ;;  %v1124_v26 = vadd.f32 %v2709_v53, %v1123_v22  ;;  %v925_v27 = vpop.f32.mrb[71].mxu0  ;;  %v1125_v28 = vpop.f32.mrb[71].mxu1 }
 0x1a1   :  { %v2039_v29 = vpack.c.bf16 %v1217_v23, %v1217_v23  ;;  %v2089_v30 = vpack.c.bf16 %v1267_v24, %v1267_v24  ;;  %v1218_v31 = vmax.f32 %v924_v25, 0.0  ;;  %v1268_v32 = vmax.f32 %v1124_v26, 0.0 }
 0x1a3   :  { %1718 = vst.msk [vmem:[%s3219_s3 + $0x88] sm:$0xf] %vm1683_vm0, %v2039_v29  ;;  %1768 = vst.msk [vmem:[%s3219_s3 + $0x150] sm:$0xf] %vm1683_vm0, %v2089_v30  ;;  %v2040_v33 = vpack.c.bf16 %v1218_v31, %v1218_v31  ;;  %v2090_v34 = vpack.c.bf16 %v1268_v32, %v1268_v32 }
 0x1a4   :  { %v928_v35 = vpop.f32.mrb[72].mxu0  ;;  %v1128_v36 = vpop.f32.mrb[72].mxu1 }
 0x1a5   :  { %1719 = vst.msk [vmem:[%s3219_s3 + $0x8c] sm:$0xf] %vm1683_vm0, %v2040_v33  ;;  %1769 = vst.msk [vmem:[%s3219_s3 + $0x154] sm:$0xf] %vm1683_vm0, %v2090_v34  ;;  %v929_v37 = vadd.f32 %v2709_v53, %v928_v35  ;;  %v1129_v38 = vadd.f32 %v2709_v53, %v1128_v36  ;;  %v930_v39 = vpop.f32.mrb[73].mxu0  ;;  %v1130_v40 = vpop.f32.mrb[73].mxu1 }
 0x1a6   :  { %v931_v41 = vpop.f32.mrb[74].mxu0  ;;  %v1131_v42 = vpop.f32.mrb[74].mxu1 }
 0x1a7   :  { %v1219_v43 = vmax.f32 %v929_v37, 0.0  ;;  %v1269_v44 = vmax.f32 %v1129_v38, 0.0  ;;  %v932_v45 = vadd.f32 %v2709_v53, %v931_v41  ;;  %v1132_v46 = vadd.f32 %v2709_v53, %v1131_v42  ;;  %v933_v47 = vpop.f32.mrb[75].mxu0  ;;  %v1133_v48 = vpop.f32.mrb[75].mxu1  ;;  %v3136_v42 = vld [vmem:[%s3218_s2] ss:$0 sm:$0xff] }
 0x1a9   :  { %v2041_v49 = vpack.c.bf16 %v1219_v43, %v1219_v43  ;;  %v2091_v50 = vpack.c.bf16 %v1269_v44, %v1269_v44  ;;  %v1220_v51 = vmax.f32 %v932_v45, 0.0  ;;  %v1270_v52 = vmax.f32 %v1132_v46, 0.0 }
 0x1ab   :  { %1720 = vst.msk [vmem:[%s3219_s3 + $0x90] sm:$0xf] %vm1683_vm0, %v2041_v49  ;;  %1770 = vst.msk [vmem:[%s3219_s3 + $0x158] sm:$0xf] %vm1683_vm0, %v2091_v50  ;;  %v2042_v54 = vpack.c.bf16 %v1220_v51, %v1220_v51  ;;  %v2092_v55 = vpack.c.bf16 %v1270_v52, %v1270_v52 }
 0x1ac   :  { %v936_v56 = vpop.f32.mrb[76].mxu0  ;;  %v1136_v57 = vpop.f32.mrb[76].mxu1 }
 0x1ad   :  { %1721 = vst.msk [vmem:[%s3219_s3 + $0x94] sm:$0xf] %vm1683_vm0, %v2042_v54  ;;  %1771 = vst.msk [vmem:[%s3219_s3 + $0x15c] sm:$0xf] %vm1683_vm0, %v2092_v55  ;;  %v937_v58 = vadd.f32 %v2709_v53, %v936_v56  ;;  %v1137_v59 = vadd.f32 %v2709_v53, %v1136_v57  ;;  %v938_v60 = vpop.f32.mrb[77].mxu0  ;;  %v1138_v61 = vpop.f32.mrb[77].mxu1 }
 0x1ae   :  { %v939_v62 = vpop.f32.mrb[78].mxu0  ;;  %v1139_v63 = vpop.f32.mrb[78].mxu1 }
 0x1af   :  { %v1221_v0 = vmax.f32 %v937_v58, 0.0  ;;  %v1271_v1 = vmax.f32 %v1137_v59, 0.0  ;;  %v940_v2 = vadd.f32 %v2709_v53, %v939_v62  ;;  %v1140_v3 = vadd.f32 %v2709_v53, %v1139_v63  ;;  %v941_v4 = vpop.f32.mrb[79].mxu0  ;;  %v1141_v5 = vpop.f32.mrb[79].mxu1 }
 0x1b1   :  { %v2043_v6 = vpack.c.bf16 %v1221_v0, %v1221_v0  ;;  %v2093_v7 = vpack.c.bf16 %v1271_v1, %v1271_v1  ;;  %v1222_v8 = vmax.f32 %v940_v2, 0.0  ;;  %v1272_v9 = vmax.f32 %v1140_v3, 0.0 }
 0x1b3   :  { %1722 = vst.msk [vmem:[%s3219_s3 + $0x98] sm:$0xf] %vm1683_vm0, %v2043_v6  ;;  %1772 = vst.msk [vmem:[%s3219_s3 + $0x160] sm:$0xf] %vm1683_vm0, %v2093_v7  ;;  %v2044_v10 = vpack.c.bf16 %v1222_v8, %v1222_v8  ;;  %v2094_v11 = vpack.c.bf16 %v1272_v9, %v1272_v9 }
 0x1b4   :  { %v944_v12 = vpop.f32.mrb[80].mxu0  ;;  %v1144_v13 = vpop.f32.mrb[80].mxu1 }
 0x1b5   :  { %1723 = vst.msk [vmem:[%s3219_s3 + $0x9c] sm:$0xf] %vm1683_vm0, %v2044_v10  ;;  %1773 = vst.msk [vmem:[%s3219_s3 + $0x164] sm:$0xf] %vm1683_vm0, %v2094_v11  ;;  %v945_v14 = vadd.f32 %v2709_v53, %v944_v12  ;;  %v1145_v15 = vadd.f32 %v2709_v53, %v1144_v13  ;;  %v946_v16 = vpop.f32.mrb[81].mxu0  ;;  %v1146_v17 = vpop.f32.mrb[81].mxu1 }
 0x1b6   :  { %v947_v18 = vpop.f32.mrb[82].mxu0  ;;  %v1147_v19 = vpop.f32.mrb[82].mxu1 }
 0x1b7   :  { %v1223_v20 = vmax.f32 %v945_v14, 0.0  ;;  %v1273_v21 = vmax.f32 %v1145_v15, 0.0  ;;  %v948_v22 = vadd.f32 %v2709_v53, %v947_v18  ;;  %v1148_v23 = vadd.f32 %v2709_v53, %v1147_v19  ;;  %v949_v24 = vpop.f32.mrb[83].mxu0  ;;  %v1149_v25 = vpop.f32.mrb[83].mxu1 }
 0x1b9   :  { %v2045_v26 = vpack.c.bf16 %v1223_v20, %v1223_v20  ;;  %v2095_v27 = vpack.c.bf16 %v1273_v21, %v1273_v21  ;;  %v1224_v28 = vmax.f32 %v948_v22, 0.0  ;;  %v1274_v29 = vmax.f32 %v1148_v23, 0.0 }
 0x1bb   :  { %1724 = vst.msk [vmem:[%s3219_s3 + $0xa0] sm:$0xf] %vm1683_vm0, %v2045_v26  ;;  %1774 = vst.msk [vmem:[%s3219_s3 + $0x168] sm:$0xf] %vm1683_vm0, %v2095_v27  ;;  %v2046_v30 = vpack.c.bf16 %v1224_v28, %v1224_v28  ;;  %v2096_v31 = vpack.c.bf16 %v1274_v29, %v1274_v29 }
 0x1bc   :  { %v952_v32 = vpop.f32.mrb[84].mxu0  ;;  %v1152_v33 = vpop.f32.mrb[84].mxu1 }
 0x1bd   :  { %1725 = vst.msk [vmem:[%s3219_s3 + $0xa4] sm:$0xf] %vm1683_vm0, %v2046_v30  ;;  %1775 = vst.msk [vmem:[%s3219_s3 + $0x16c] sm:$0xf] %vm1683_vm0, %v2096_v31  ;;  %v953_v34 = vadd.f32 %v2709_v53, %v952_v32  ;;  %v1153_v35 = vadd.f32 %v2709_v53, %v1152_v33  ;;  %v954_v36 = vpop.f32.mrb[85].mxu0  ;;  %v1154_v37 = vpop.f32.mrb[85].mxu1 }
 0x1be   :  { %v955_v38 = vpop.f32.mrb[86].mxu0  ;;  %v1155_v39 = vpop.f32.mrb[86].mxu1 }
 0x1bf   :  { %v1225_v40 = vmax.f32 %v953_v34, 0.0  ;;  %v1275_v41 = vmax.f32 %v1153_v35, 0.0  ;;  %v956_v43 = vadd.f32 %v3136_v42, %v955_v38  ;;  %v1156_v44 = vadd.f32 %v3136_v42, %v1155_v39  ;;  %v957_v45 = vpop.f32.mrb[87].mxu0  ;;  %v1157_v46 = vpop.f32.mrb[87].mxu1 }
 0x1c1   :  { %v2047_v47 = vpack.c.bf16 %v1225_v40, %v1225_v40  ;;  %v2097_v48 = vpack.c.bf16 %v1275_v41, %v1275_v41  ;;  %v1226_v53 = vmax.f32 %v956_v43, 0.0  ;;  %v1276_v49 = vmax.f32 %v1156_v44, 0.0 }
 0x1c3   :  { %1726 = vst.msk [vmem:[%s3219_s3 + $0xa8] sm:$0xf] %vm1683_vm0, %v2047_v47  ;;  %1776 = vst.msk [vmem:[%s3219_s3 + $0x170] sm:$0xf] %vm1683_vm0, %v2097_v48  ;;  %v2048_v50 = vpack.c.bf16 %v1226_v53, %v1226_v53  ;;  %v2098_v51 = vpack.c.bf16 %v1276_v49, %v1276_v49 }
 0x1c4   :  { %v960_v52 = vpop.f32.mrb[88].mxu0  ;;  %v1160_v54 = vpop.f32.mrb[88].mxu1 }
 0x1c5   :  { %1727 = vst.msk [vmem:[%s3219_s3 + $0xac] sm:$0xf] %vm1683_vm0, %v2048_v50  ;;  %1777 = vst.msk [vmem:[%s3219_s3 + $0x174] sm:$0xf] %vm1683_vm0, %v2098_v51  ;;  %v961_v55 = vadd.f32 %v3136_v42, %v960_v52  ;;  %v1161_v56 = vadd.f32 %v3136_v42, %v1160_v54  ;;  %v962_v57 = vpop.f32.mrb[89].mxu0  ;;  %v1162_v58 = vpop.f32.mrb[89].mxu1 }
 0x1c6   :  { %v963_v59 = vpop.f32.mrb[90].mxu0  ;;  %v1163_v60 = vpop.f32.mrb[90].mxu1 }
 0x1c7   :  { %v1227_v61 = vmax.f32 %v961_v55, 0.0  ;;  %v1277_v62 = vmax.f32 %v1161_v56, 0.0  ;;  %v964_v63 = vadd.f32 %v3136_v42, %v963_v59  ;;  %v1164_v0 = vadd.f32 %v3136_v42, %v1163_v60  ;;  %v965_v1 = vpop.f32.mrb[91].mxu0  ;;  %v1165_v2 = vpop.f32.mrb[91].mxu1 }
 0x1c9   :  { %v2049_v3 = vpack.c.bf16 %v1227_v61, %v1227_v61  ;;  %v2099_v4 = vpack.c.bf16 %v1277_v62, %v1277_v62  ;;  %v1228_v5 = vmax.f32 %v964_v63, 0.0  ;;  %v1278_v6 = vmax.f32 %v1164_v0, 0.0 }
 0x1cb   :  { %1728 = vst.msk [vmem:[%s3219_s3 + $0xb0] sm:$0xf] %vm1683_vm0, %v2049_v3  ;;  %1778 = vst.msk [vmem:[%s3219_s3 + $0x178] sm:$0xf] %vm1683_vm0, %v2099_v4  ;;  %v2050_v7 = vpack.c.bf16 %v1228_v5, %v1228_v5  ;;  %v2100_v8 = vpack.c.bf16 %v1278_v6, %v1278_v6 }
 0x1cc   :  { %v968_v9 = vpop.f32.mrb[92].mxu0  ;;  %v1168_v10 = vpop.f32.mrb[92].mxu1 }
 0x1cd   :  { %1729 = vst.msk [vmem:[%s3219_s3 + $0xb4] sm:$0xf] %vm1683_vm0, %v2050_v7  ;;  %1779 = vst.msk [vmem:[%s3219_s3 + $0x17c] sm:$0xf] %vm1683_vm0, %v2100_v8  ;;  %v969_v11 = vadd.f32 %v3136_v42, %v968_v9  ;;  %v1169_v12 = vadd.f32 %v3136_v42, %v1168_v10  ;;  %v970_v13 = vpop.f32.mrb[93].mxu0  ;;  %v1170_v14 = vpop.f32.mrb[93].mxu1 }
 0x1ce   :  { %v971_v15 = vpop.f32.mrb[94].mxu0  ;;  %v1171_v16 = vpop.f32.mrb[94].mxu1 }
 0x1cf   :  { %v1229_v17 = vmax.f32 %v969_v11, 0.0  ;;  %v1279_v18 = vmax.f32 %v1169_v12, 0.0  ;;  %v972_v19 = vadd.f32 %v3136_v42, %v971_v15  ;;  %v1172_v20 = vadd.f32 %v3136_v42, %v1171_v16  ;;  %v973_v21 = vpop.f32.mrb[95].mxu0  ;;  %v1173_v22 = vpop.f32.mrb[95].mxu1 }
 0x1d1   :  { %v2051_v23 = vpack.c.bf16 %v1229_v17, %v1229_v17  ;;  %v2101_v24 = vpack.c.bf16 %v1279_v18, %v1279_v18  ;;  %v1230_v25 = vmax.f32 %v972_v19, 0.0  ;;  %v1280_v26 = vmax.f32 %v1172_v20, 0.0 }
 0x1d3   :  { %1730 = vst.msk [vmem:[%s3219_s3 + $0xb8] sm:$0xf] %vm1683_vm0, %v2051_v23  ;;  %1780 = vst.msk [vmem:[%s3219_s3 + $0x180] sm:$0xf] %vm1683_vm0, %v2101_v24  ;;  %v2052_v27 = vpack.c.bf16 %v1230_v25, %v1230_v25  ;;  %v2102_v28 = vpack.c.bf16 %v1280_v26, %v1280_v26 }
 0x1d4   :  { %v976_v29 = vpop.f32.mrb[96].mxu0  ;;  %v1176_v30 = vpop.f32.mrb[96].mxu1 }
 0x1d5   :  { %1731 = vst.msk [vmem:[%s3219_s3 + $0xbc] sm:$0xf] %vm1683_vm0, %v2052_v27  ;;  %1781 = vst.msk [vmem:[%s3219_s3 + $0x184] sm:$0xf] %vm1683_vm0, %v2102_v28  ;;  %v977_v31 = vadd.f32 %v3136_v42, %v976_v29  ;;  %v1177_v32 = vadd.f32 %v3136_v42, %v1176_v30  ;;  %v978_v33 = vpop.f32.mrb[97].mxu0  ;;  %v1178_v34 = vpop.f32.mrb[97].mxu1 }
 0x1d6   :  { %v979_v35 = vpop.f32.mrb[98].mxu0  ;;  %v1179_v36 = vpop.f32.mrb[98].mxu1 }
 0x1d7   :  { %v1231_v37 = vmax.f32 %v977_v31, 0.0  ;;  %v1281_v38 = vmax.f32 %v1177_v32, 0.0  ;;  %v980_v39 = vadd.f32 %v3136_v42, %v979_v35  ;;  %v1180_v40 = vadd.f32 %v3136_v42, %v1179_v36  ;;  %v981_v41 = vpop.f32.mrb[99].mxu0  ;;  %v1181_v43 = vpop.f32.mrb[99].mxu1 }
 0x1d9   :  { %v2053_v44 = vpack.c.bf16 %v1231_v37, %v1231_v37  ;;  %v2103_v45 = vpack.c.bf16 %v1281_v38, %v1281_v38  ;;  %v1232_v46 = vmax.f32 %v980_v39, 0.0  ;;  %v1282_v47 = vmax.f32 %v1180_v40, 0.0 }
 0x1db   :  { %1732 = vst.msk [vmem:[%s3219_s3 + $0xc0] sm:$0xf] %vm1683_vm0, %v2053_v44  ;;  %1782 = vst.msk [vmem:[%s3219_s3 + $0x188] sm:$0xf] %vm1683_vm0, %v2103_v45  ;;  %v2054_v48 = vpack.c.bf16 %v1232_v46, %v1232_v46  ;;  %v2104_v53 = vpack.c.bf16 %v1282_v47, %v1282_v47 }
 0x1dd   :  { %1733 = vst.msk [vmem:[%s3219_s3 + $0xc4] sm:$0xf] %vm1683_vm0, %v2054_v48  ;;  %1783 = vst.msk [vmem:[%s3219_s3 + $0x18c] sm:$0xf] %vm1683_vm0, %v2104_v53 }

// kernel: policy_act.3
= control target key start
LH: loop header
LB: loop body
LE: loop exit
PB: predicated region body
PF: predicated region fallthrough
CT: control target
= control target key end

     0   :  { %16 = vsyncpa [#allocation4], 0  ;;  %vm436_vm0 = vcmask 261120   ;;  %vm457_vm1 = vcmask 254976   ;;  %s1461_s0 = inlined_call_operand.vmem [shape: bf16[162,256], index: 0, kind: input, shape index: {}]   ;;  %s1462_s1 = inlined_call_operand.vmem [shape: bf16[256,32], index: 1, kind: input, shape index: {}]   ;;  %s1463_s2 = inlined_call_operand.vmem [shape: f32[1,32], index: 2, kind: input, shape index: {}]   ;;  %s1464_s3 = inlined_call_operand.vmem [shape: bf16[81,32,256], index: 3, kind: input, shape index: {}]   ;;  %s1465_s4 = inlined_call_operand.vmem [shape: f32[1,256], index: 4, kind: input, shape index: {}]   ;;  %s1466_s5 = inlined_call_operand.vmem [shape: bf16[256,7], index: 5, kind: input, shape index: {}]   ;;  %s1467_s6 = inlined_call_operand.vmem [shape: f32[1,7], index: 6, kind: input, shape index: {}]   ;;  %s1468_s7 = inlined_call_operand.vmem [shape: f32[2,1], index: 7, kind: output, shape index: {0}]   ;;  %s1469_s8 = inlined_call_operand.hbm [shape: f32[2,6], index: 8, kind: output, shape index: {1}]   ;;  %s1470_s9 = inlined_call_operand.vmem [shape: s32[2,1], index: 9, kind: output, shape index: {2}]   ;;  %s1471_s10 = inlined_call_operand.vmem [shape: f32[2,1], index: 10, kind: output, shape index: {3}]  }
   0x1   :  { %v1034_v0 = vld [vmem:[%s1462_s1 + $0x40] sm:$0xff]   ;;  %v1036_v2 = vld [vmem:[%s1462_s1 + $0x48] sm:$0xff]   ;;  %v1038_v4 = vld [vmem:[%s1462_s1 + $0x50] sm:$0xff]  }
   0x2   :  { %v1035_v1 = vld [vmem:[%s1462_s1] sm:$0xff]   ;;  %884 = vmatprep.subr.bf16.mxu0 %v1034_v0  ;;  %988 = vmatprep.subr.bf16.mxu1 %v1034_v0  ;;  %v1037_v3 = vld [vmem:[%s1462_s1 + $0x8] sm:$0xff]   ;;  %v1039_v5 = vld [vmem:[%s1462_s1 + $0x10] sm:$0xff]  }
   0x3   :  { %885 = vmatpush3.bf16.msra.mxu0 %v1035_v1  ;;  %996 = vmatpush3.bf16.msra.mxu1 %v1035_v1  ;;  %v1040_v6 = vld [vmem:[%s1462_s1 + $0x58] sm:$0xff]   ;;  %v1042_v8 = vld [vmem:[%s1462_s1 + $0x60] sm:$0xff]   ;;  %v1044_v10 = vld [vmem:[%s1462_s1 + $0x68] sm:$0xff]  }
   0x4   :  { %886 = vmatprep.subr.bf16.mxu0 %v1036_v2  ;;  %989 = vmatprep.subr.bf16.mxu1 %v1036_v2  ;;  %v1041_v7 = vld [vmem:[%s1462_s1 + $0x18] sm:$0xff]   ;;  %v1043_v9 = vld [vmem:[%s1462_s1 + $0x20] sm:$0xff]   ;;  %v1045_v13 = vld [vmem:[%s1462_s1 + $0x28] sm:$0xff]  }
   0x5   :  { %v1052_v11 = vld [vmem:[%s1461_s0 + $0x4] ss:$8 sps:$4 sm:$0xff]   ;;  %v1046_v14 = vld [vmem:[%s1462_s1 + $0x70] sm:$0xff]   ;;  %v1048_v16 = vld [vmem:[%s1462_s1 + $0x78] sm:$0xff]  }
   0x6   :  { %v1055_v12 = vld [vmem:[%s1461_s0 + $0x64] ss:$8 sps:$4 sm:$0xff]   ;;  %327 = vmatprep.mubr.bf16.mxu0 %v1052_v11  ;;  %v1047_v15 = vld [vmem:[%s1462_s1 + $0x30] sm:$0xff]   ;;  %v1049_v17 = vld [vmem:[%s1462_s1 + $0x38] sm:$0xff]  }
   0x7   :  { %887 = vmatpush3.bf16.msra.mxu0 %v1037_v3  ;;  %997 = vmatpush3.bf16.msra.mxu1 %v1037_v3  ;;  %v1050_v18 = vld [vmem:[%s1461_s0] ss:$8 sps:$4 sm:$0xff]   ;;  %v1056_v20 = vld [vmem:[%s1461_s0 + $0x14] ss:$8 sps:$4 sm:$0xff]   ;;  %v1058_v22 = vld [vmem:[%s1461_s0 + $0x10] ss:$8 sps:$4 sm:$0xff]  }
   0x8   :  { %888 = vmatprep.subr.bf16.mxu0 %v1038_v4  ;;  %990 = vmatprep.subr.bf16.mxu1 %v1038_v4  ;;  %v1053_v19 = vld [vmem:[%s1461_s0 + $0x60] ss:$8 sps:$4 sm:$0xff]   ;;  %v1059_v21 = vld [vmem:[%s1461_s0 + $0x74] ss:$8 sps:$4 sm:$0xff]   ;;  %v1063_v23 = vld [vmem:[%s1461_s0 + $0x70] ss:$8 sps:$4 sm:$0xff]  }
   0x9   :  { %375 = vmatprep.mubr.bf16.mxu1 %v1055_v12  ;;  %v1061_v24 = vld [vmem:[%s1461_s0 + $0x24] ss:$8 sps:$4 sm:$0xff]   ;;  %v1064_v26 = vld [vmem:[%s1461_s0 + $0x20] ss:$8 sps:$4 sm:$0xff]   ;;  %v1067_v28 = vld [vmem:[%s1461_s0 + $0x34] ss:$8 sps:$4 sm:$0xff]  }
   0xa   :  { %v1065_v25 = vld [vmem:[%s1461_s0 + $0x84] ss:$8 sps:$4 sm:$0xff]   ;;  %v1069_v27 = vld [vmem:[%s1461_s0 + $0x80] ss:$8 sps:$4 sm:$0xff]   ;;  %v1071_v29 = vld [vmem:[%s1461_s0 + $0x94] ss:$8 sps:$4 sm:$0xff]  }
   0xb   :  { %889 = vmatpush3.bf16.msra.mxu0 %v1039_v5  ;;  %998 = vmatpush3.bf16.msra.mxu1 %v1039_v5  ;;  %v52_v30 = vld [vmem:[%s1461_s0 + $0xa0] sm:$0x11]  ;;  %v1070_v31 = vld [vmem:[%s1461_s0 + $0x30] ss:$8 sps:$4 sm:$0xff]   ;;  %v1078_v37 = vld [vmem:[%s1461_s0 + $0x54] ss:$8 sps:$4 sm:$0xff]  }
   0xc   :  { %890 = vmatprep.subr.bf16.mxu0 %v1040_v6  ;;  %991 = vmatprep.subr.bf16.mxu1 %v1040_v6  ;;  %v1075_v32 = vld [vmem:[%s1461_s0 + $0x90] ss:$8 sps:$4 sm:$0xff]   ;;  %v1073_v33 = vld [vmem:[%s1461_s0 + $0x44] ss:$8 sps:$4 sm:$0xff]   ;;  %v841_v34 = vcombine.high %v52_v30, %v52_v30  ;;  %v1076_v35 = vld [vmem:[%s1461_s0 + $0x40] ss:$8 sps:$4 sm:$0xff]   ;;  %v840_v36 = vcombine.low %v52_v30, %v52_v30 }
   0xd   :  { %v1081_v38 = vld [vmem:[%s1461_s0 + $0x50] ss:$8 sps:$4 sm:$0xff]   ;;  %v1329_v41 = vld [vmem:[%s1463_s2] ss:$0 sm:$0xff]  ;;  %s1372_s0 = smov 0  }
   0xf   :  { %891 = vmatpush3.bf16.msra.mxu0 %v1041_v7  ;;  %999 = vmatpush3.bf16.msra.mxu1 %v1041_v7 }
  0x10   :  { %892 = vmatprep.subr.bf16.mxu0 %v1042_v8  ;;  %992 = vmatprep.subr.bf16.mxu1 %v1042_v8 }
  0x13   :  { %893 = vmatpush3.bf16.msra.mxu0 %v1043_v9  ;;  %1000 = vmatpush3.bf16.msra.mxu1 %v1043_v9 }
  0x14   :  { %894 = vmatprep.subr.bf16.mxu0 %v1044_v10  ;;  %993 = vmatprep.subr.bf16.mxu1 %v1044_v10 }
  0x17   :  { %895 = vmatpush3.bf16.msra.mxu0 %v1045_v13  ;;  %1001 = vmatpush3.bf16.msra.mxu1 %v1045_v13 }
  0x18   :  { %896 = vmatprep.subr.bf16.mxu0 %v1046_v14  ;;  %994 = vmatprep.subr.bf16.mxu1 %v1046_v14 }
  0x1b   :  { %897 = vmatpush3.bf16.msra.mxu0 %v1047_v15  ;;  %1002 = vmatpush3.bf16.msra.mxu1 %v1047_v15 }
  0x1c   :  { %898 = vmatprep.subr.bf16.mxu0 %v1048_v16  ;;  %995 = vmatprep.subr.bf16.mxu1 %v1048_v16 }
  0x1f   :  { %899 = vmatpush3.bf16.msra.mxu0 %v1049_v17  ;;  %1003 = vmatpush3.bf16.msra.mxu1 %v1049_v17 }
  0x22   :  { %328 = vmatmul.mubr.bf16.vlgmr.msra.gmra.mrb[0].mxu0 %v1050_v18  ;;  %376 = vmatmul.mubr.bf16.vlgmr.msra.gmra.mrb[0].mxu1 %v1053_v19 }
  0x23   :  { %335 = vmatprep.mubr.bf16.mxu0 %v1056_v20  ;;  %383 = vmatprep.mubr.bf16.mxu1 %v1059_v21 }
  0x2a   :  { %336 = vmatmul.mubr.bf16.gmra.mrb[4].mxu0 %v1058_v22  ;;  %384 = vmatmul.mubr.bf16.gmra.mrb[4].mxu1 %v1063_v23 }
  0x2b   :  { %343 = vmatprep.mubr.bf16.mxu0 %v1061_v24  ;;  %391 = vmatprep.mubr.bf16.mxu1 %v1065_v25 }
  0x32   :  { %344 = vmatmul.mubr.bf16.gmra.mrb[8].mxu0 %v1064_v26  ;;  %392 = vmatmul.mubr.bf16.gmra.mrb[8].mxu1 %v1069_v27 }
  0x33   :  { %351 = vmatprep.mubr.bf16.mxu0 %v1067_v28  ;;  %399 = vmatprep.mubr.bf16.mxu1 %v1071_v29 }
  0x3a   :  { %352 = vmatmul.mubr.bf16.gmra.mrb[12].mxu0 %v1070_v31  ;;  %400 = vmatmul.mubr.bf16.gmra.mrb[12].mxu1 %v1075_v32 }
  0x3b   :  { %359 = vmatprep.mubr.bf16.mxu0 %v1073_v33  ;;  %407 = vmatprep.mubr.bf16.mxu1 %v841_v34 }
  0x42   :  { %360 = vmatmul.mubr.bf16.gmra.mrb[16].mxu0 %v1076_v35  ;;  %408 = vmatmul.mubr.bf16.gmra.mrb[16].mxu1 %v840_v36 }
  0x43   :  { %367 = vmatprep.mubr.bf16.mxu0 %v1078_v37 }
  0x4a   :  { %368 = vmatmul.mubr.bf16.gmra.mrb[20].mxu0 %v1081_v38 }
  0xf5   :  { %v900_v39 = vpop.f32.mrb[0].mxu0  ;;  %v936_v40 = vpop.f32.mrb[0].mxu1 }
  0xf6   :  { %v901_v42 = vpop.f32.mrb[1].mxu0  ;;  %v937_v43 = vpop.f32.mrb[1].mxu1 }
  0xf7   :  { %v902_v44 = vadd.f32 %v901_v42, %v900_v39  ;;  %v903_v45 = vpop.f32.mrb[2].mxu0  ;;  %v938_v46 = vadd.f32 %v937_v43, %v936_v40  ;;  %v939_v47 = vpop.f32.mrb[2].mxu1 }
  0xf8   :  { %v904_v48 = vpop.f32.mrb[3].mxu0  ;;  %v940_v49 = vpop.f32.mrb[3].mxu1 }
  0xf9   :  { %v330_v50 = vadd.f32 %v902_v44, %v1329_v41  ;;  %v905_v51 = vadd.f32 %v904_v48, %v903_v45  ;;  %v378_v52 = vadd.f32 %v938_v46, %v1329_v41  ;;  %v941_v53 = vadd.f32 %v940_v49, %v939_v47 }
  0xfb   :  { %v415_v54 = vmax.f32 %v330_v50, 0.0  ;;  %v333_v55 = vadd.f32 %v905_v51, %v1329_v41  ;;  %v427_v56 = vmax.f32 %v378_v52, 0.0  ;;  %v381_v57 = vadd.f32 %v941_v53, %v1329_v41 }
  0xfd   :  { %437 = vst.msk [vmem:[#allocation2] sm:$0xff] %vm436_vm0, %v415_v54  ;;  %v416_v58 = vmax.f32 %v333_v55, 0.0  ;;  %v906_v59 = vpop.f32.mrb[4].mxu0  ;;  %449 = vst.msk [vmem:[#allocation2 + $0x60] sm:$0xff] %vm436_vm0, %v427_v56  ;;  %v428_v60 = vmax.f32 %v381_v57, 0.0  ;;  %v942_v61 = vpop.f32.mrb[4].mxu1 }
  0xfe   :  { %v907_v62 = vpop.f32.mrb[5].mxu0  ;;  %v943_v63 = vpop.f32.mrb[5].mxu1 }
  0xff   :  { %438 = vst.msk [vmem:[#allocation2 + $0x8] sm:$0xff] %vm436_vm0, %v416_v58  ;;  %v908_v0 = vadd.f32 %v907_v62, %v906_v59  ;;  %v909_v1 = vpop.f32.mrb[6].mxu0  ;;  %450 = vst.msk [vmem:[#allocation2 + $0x68] sm:$0xff] %vm436_vm0, %v428_v60  ;;  %v944_v2 = vadd.f32 %v943_v63, %v942_v61  ;;  %v945_v3 = vpop.f32.mrb[6].mxu1 }
 0x100   :  { %v910_v4 = vpop.f32.mrb[7].mxu0  ;;  %v946_v5 = vpop.f32.mrb[7].mxu1 }
 0x101   :  { %v338_v6 = vadd.f32 %v908_v0, %v1329_v41  ;;  %v911_v7 = vadd.f32 %v910_v4, %v909_v1  ;;  %v386_v8 = vadd.f32 %v944_v2, %v1329_v41  ;;  %v947_v9 = vadd.f32 %v946_v5, %v945_v3 }
 0x103   :  { %v417_v10 = vmax.f32 %v338_v6, 0.0  ;;  %v341_v11 = vadd.f32 %v911_v7, %v1329_v41  ;;  %v429_v12 = vmax.f32 %v386_v8, 0.0  ;;  %v389_v13 = vadd.f32 %v947_v9, %v1329_v41 }
 0x105   :  { %439 = vst.msk [vmem:[#allocation2 + $0x10] sm:$0xff] %vm436_vm0, %v417_v10  ;;  %v418_v14 = vmax.f32 %v341_v11, 0.0  ;;  %v912_v15 = vpop.f32.mrb[8].mxu0  ;;  %451 = vst.msk [vmem:[#allocation2 + $0x70] sm:$0xff] %vm436_vm0, %v429_v12  ;;  %v430_v16 = vmax.f32 %v389_v13, 0.0  ;;  %v948_v17 = vpop.f32.mrb[8].mxu1 }
 0x106   :  { %v913_v18 = vpop.f32.mrb[9].mxu0  ;;  %v949_v19 = vpop.f32.mrb[9].mxu1 }
 0x107   :  { %440 = vst.msk [vmem:[#allocation2 + $0x18] sm:$0xff] %vm436_vm0, %v418_v14  ;;  %v914_v20 = vadd.f32 %v913_v18, %v912_v15  ;;  %v915_v21 = vpop.f32.mrb[10].mxu0  ;;  %452 = vst.msk [vmem:[#allocation2 + $0x78] sm:$0xff] %vm436_vm0, %v430_v16  ;;  %v950_v22 = vadd.f32 %v949_v19, %v948_v17  ;;  %v951_v23 = vpop.f32.mrb[10].mxu1 }
 0x108   :  { %v916_v24 = vpop.f32.mrb[11].mxu0  ;;  %v952_v25 = vpop.f32.mrb[11].mxu1 }
 0x109   :  { %v346_v26 = vadd.f32 %v914_v20, %v1329_v41  ;;  %v917_v27 = vadd.f32 %v916_v24, %v915_v21  ;;  %v394_v28 = vadd.f32 %v950_v22, %v1329_v41  ;;  %v953_v29 = vadd.f32 %v952_v25, %v951_v23 }
 0x10a   :  { %v1144_v20 = vmov 0.0   ;;  %v1148_v21 = vmov 0.0  }
 0x10b   :  { %v419_v30 = vmax.f32 %v346_v26, 0.0  ;;  %v349_v31 = vadd.f32 %v917_v27, %v1329_v41  ;;  %v431_v32 = vmax.f32 %v394_v28, 0.0  ;;  %v397_v33 = vadd.f32 %v953_v29, %v1329_v41 }
 0x10d   :  { %441 = vst.msk [vmem:[#allocation2 + $0x20] sm:$0xff] %vm436_vm0, %v419_v30  ;;  %v420_v34 = vmax.f32 %v349_v31, 0.0  ;;  %v918_v35 = vpop.f32.mrb[12].mxu0  ;;  %453 = vst.msk [vmem:[#allocation2 + $0x80] sm:$0xff] %vm436_vm0, %v431_v32  ;;  %v432_v36 = vmax.f32 %v397_v33, 0.0  ;;  %v954_v37 = vpop.f32.mrb[12].mxu1 }
 0x10e   :  { %v919_v38 = vpop.f32.mrb[13].mxu0  ;;  %v955_v39 = vpop.f32.mrb[13].mxu1 }
 0x10f   :  { %442 = vst.msk [vmem:[#allocation2 + $0x28] sm:$0xff] %vm436_vm0, %v420_v34  ;;  %v920_v40 = vadd.f32 %v919_v38, %v918_v35  ;;  %v921_v42 = vpop.f32.mrb[14].mxu0  ;;  %454 = vst.msk [vmem:[#allocation2 + $0x88] sm:$0xff] %vm436_vm0, %v432_v36  ;;  %v956_v43 = vadd.f32 %v955_v39, %v954_v37  ;;  %v957_v44 = vpop.f32.mrb[14].mxu1 }
 0x110   :  { %v922_v45 = vpop.f32.mrb[15].mxu0  ;;  %v958_v46 = vpop.f32.mrb[15].mxu1 }
 0x111   :  { %v354_v47 = vadd.f32 %v920_v40, %v1329_v41  ;;  %v923_v48 = vadd.f32 %v922_v45, %v921_v42  ;;  %v402_v49 = vadd.f32 %v956_v43, %v1329_v41  ;;  %v959_v50 = vadd.f32 %v958_v46, %v957_v44 }
 0x113   :  { %v421_v51 = vmax.f32 %v354_v47, 0.0  ;;  %v357_v52 = vadd.f32 %v923_v48, %v1329_v41  ;;  %v433_v53 = vmax.f32 %v402_v49, 0.0  ;;  %v405_v54 = vadd.f32 %v959_v50, %v1329_v41 }
 0x115   :  { %443 = vst.msk [vmem:[#allocation2 + $0x30] sm:$0xff] %vm436_vm0, %v421_v51  ;;  %v422_v55 = vmax.f32 %v357_v52, 0.0  ;;  %v924_v56 = vpop.f32.mrb[16].mxu0  ;;  %455 = vst.msk [vmem:[#allocation2 + $0x90] sm:$0xff] %vm436_vm0, %v433_v53  ;;  %v434_v57 = vmax.f32 %v405_v54, 0.0  ;;  %v960_v58 = vpop.f32.mrb[16].mxu1 }
 0x116   :  { %v925_v59 = vpop.f32.mrb[17].mxu0  ;;  %v961_v60 = vpop.f32.mrb[17].mxu1 }
 0x117   :  { %444 = vst.msk [vmem:[#allocation2 + $0x38] sm:$0xff] %vm436_vm0, %v422_v55  ;;  %v926_v61 = vadd.f32 %v925_v59, %v924_v56  ;;  %v927_v62 = vpop.f32.mrb[18].mxu0  ;;  %456 = vst.msk [vmem:[#allocation2 + $0x98] sm:$0xff] %vm436_vm0, %v434_v57  ;;  %v962_v63 = vadd.f32 %v961_v60, %v960_v58  ;;  %v963_v0 = vpop.f32.mrb[18].mxu1 }
 0x118   :  { %v928_v1 = vpop.f32.mrb[19].mxu0  ;;  %v964_v2 = vpop.f32.mrb[19].mxu1 }
 0x119   :  { %v362_v3 = vadd.f32 %v926_v61, %v1329_v41  ;;  %v929_v4 = vadd.f32 %v928_v1, %v927_v62  ;;  %v410_v5 = vadd.f32 %v962_v63, %v1329_v41 }
 0x11b   :  { %v423_v6 = vmax.f32 %v362_v3, 0.0  ;;  %v365_v7 = vadd.f32 %v929_v4, %v1329_v41  ;;  %v435_v8 = vmax.f32 %v410_v5, 0.0 }
 0x11d   :  { %445 = vst.msk [vmem:[#allocation2 + $0x40] sm:$0xff] %vm436_vm0, %v423_v6  ;;  %v424_v9 = vmax.f32 %v365_v7, 0.0  ;;  %v930_v10 = vpop.f32.mrb[20].mxu0 }
 0x11e   :  { %458 = vst.msk [vmem:[#allocation2 + $0xa0] sm:$0x3] %vm457_vm1, %v435_v8  ;;  %v931_v11 = vpop.f32.mrb[21].mxu0 }
 0x11f   :  { %446 = vst.msk [vmem:[#allocation2 + $0x48] sm:$0xff] %vm436_vm0, %v424_v9  ;;  %v932_v12 = vadd.f32 %v931_v11, %v930_v10  ;;  %v933_v13 = vpop.f32.mrb[22].mxu0 }
 0x120   :  { %v934_v14 = vpop.f32.mrb[23].mxu0 }
 0x121   :  { %v370_v15 = vadd.f32 %v932_v12, %v1329_v41  ;;  %v935_v16 = vadd.f32 %v934_v14, %v933_v13 }
 0x123   :  { %v425_v17 = vmax.f32 %v370_v15, 0.0  ;;  %v373_v18 = vadd.f32 %v935_v16, %v1329_v41 }
 0x125   :  { %447 = vst.msk [vmem:[#allocation2 + $0x50] sm:$0xff] %vm436_vm0, %v425_v17  ;;  %v426_v19 = vmax.f32 %v373_v18, 0.0 }
 0x127   :  { %448 = vst.msk [vmem:[#allocation2 + $0x58] sm:$0xff] %vm436_vm0, %v426_v19 }
 0x128 LB: > { %v1156_v22 = vmov 0   ;;  %s883_s2 = sshll.u32 %s1154_s0, 5  ;;  %s858_s27 = sshll.u32 %s1154_s0, 1  ;;  %s1154_s0 = sphi %s1372_s0, %s464_s0   ;;  %v1150_v21 = vphi %v1148_v21, %v1149_v21   ;;  %v1146_v20 = vphi %v1144_v20, %v1145_v20  }
 0x129   : > { %533 = vmatprep.mubr.bf16.mxu0 %v1156_v22  ;;  %s473_s30 = scalar_lea.vmem %s1464_s3, %s883_s2  ;;  %s468_s11 = scalar_lea.vmem [#allocation2], %s858_s27 }
 0x12a   : > { %v1082_v41 = vld [vmem:[%s473_s30 + $0x4] ss:$8 sps:$4 sm:$0xff]   ;;  %v1084_v23 = vld [vmem:[%s473_s30] ss:$8 sps:$4 sm:$0xff]   ;;  %v1085_v24 = vld [vmem:[%s473_s30 + $0x14] ss:$8 sps:$4 sm:$0xff]  }
 0x12b   : > { %501 = vmatprep.subr.bf16.mxu0 %v1082_v41  ;;  %v1087_v25 = vld [vmem:[%s473_s30 + $0x10] ss:$8 sps:$4 sm:$0xff]   ;;  %s464_s0 = sadd.s32 1, %s1154_s0  }
 0x12c   : > { %502 = vmatpush1.bf16.msra.mxu0 %v1084_v23  ;;  %p461_p0 = scmp.ge.s32.totalorder %s464_s0, 81  }
 0x12d   : > { %503 = vmatprep.subr.bf16.mxu0 %v1085_v24  ;;  %v1088_v34 = vld [vmem:[%s1466_s5 + $0x40] sm:$0xff] (%p461_p0)   ;;  %v1090_v36 = vld [vmem:[%s1466_s5 + $0x48] sm:$0xff] (%p461_p0)   ;;  %v1092_v38 = vld [vmem:[%s1466_s5 + $0x50] sm:$0xff] (%p461_p0)   ;;  %v546_v39 = vlaneseq (%p461_p0)  ;;  %s1157_s3 = smov (%p461_p0), 1   ;;  %vm745_vm2 = vcmask (%p461_p0), 50184   ;;  %vm737_vm3 = vcmask (%p461_p0), 1024  }
 0x12e   : > { %v469_v26 = vld [vmem:[%s468_s11] sm:$0x3]  ;;  %v1091_v37 = vld [vmem:[%s1466_s5 + $0x8] sm:$0xff] (%p461_p0)   ;;  %v1093_v40 = vld [vmem:[%s1466_s5 + $0x10] sm:$0xff] (%p461_p0)   ;;  %vm743_vm5 = vcmask (%p461_p0), 41984   ;;  %s1159_s24 = smov (%p461_p0), [#allocation3]  }
 0x12f   : > { %v470_v27 = vpack.c.bf16 %v469_v26, %v469_v26  ;;  %v1089_v35 = vld [vmem:[%s1466_s5] sm:$0xff] (%p461_p0)   ;;  %v1094_v42 = vld [vmem:[%s1466_s5 + $0x58] sm:$0xff] (%p461_p0)   ;;  %v547_v43 = vshrl.u32 (%p461_p0), %v546_v39, 7  ;;  %v1098_v49 = vld [vmem:[%s1466_s5 + $0x68] sm:$0xff] (%p461_p0)   ;;  %v765_v0 = vand.u32 (%p461_p0), 127, %v546_v39  ;;  %s786_s25 = sshll.u32 (%p461_p0), %s1159_s24, 4  ;;  %s787_s25 = int_to_ptr.vmem [resolvable:$true] %s786_s25 }
 0x130   : > { %504 = vmatpush1.bf16.msra.mxu0 %v1087_v25  ;;  %v1095_v44 = vld [vmem:[%s1466_s5 + $0x18] sm:$0xff] (%p461_p0)   ;;  %v1096_v45 = vld [vmem:[%s1466_s5 + $0x60] sm:$0xff] (%p461_p0)   ;;  %v1099_v53 = vld [vmem:[%s1466_s5 + $0x28] sm:$0xff] (%p461_p0)   ;;  %s1108_s26 = scalar_lea.vmem (%p461_p0), %s787_s25, 32  ;;  %p1113_p2 = scmp.lt.s32.totalorder (%p461_p0), %s787_s25, %s787_s25 }
 0x131   :  { %966 = vmatprep.subr.bf16.mxu0 (%p461_p0), %v1088_v34  ;;  %v552_v46 = vsub.s32 (%p461_p0), 1, %v547_v43  ;;  %v548_v47 = vsub.s32 (%p461_p0), 0, %v547_v43  ;;  %v1097_v48 = vld [vmem:[%s1466_s5 + $0x20] sm:$0xff] (%p461_p0)   ;;  %v1100_v55 = vld [vmem:[%s1466_s5 + $0x70] sm:$0xff] (%p461_p0)   ;;  %v1102_v60 = vld [vmem:[%s1466_s5 + $0x78] sm:$0xff] (%p461_p0)   ;;  %v766_v1 = vcvt.s32.f32 (%p461_p0), %v765_v0  ;;  %p1109_p1 = scmp.ne.s32.totalorder (%p461_p0), %s787_s25, %s1108_s26  ;;  %p1114_p3 = scmp.lt.s32.totalorder (%p461_p0), %s1108_s26, %s1108_s26 }
 0x132   :  { %v544_v50 = vld [vmem:[%s1465_s4] sm:$0x3] (%p461_p0)  ;;  %v1101_v58 = vld [vmem:[%s1466_s5 + $0x30] sm:$0xff] (%p461_p0)   ;;  %v1103_v62 = vld [vmem:[%s1466_s5 + $0x38] sm:$0xff] (%p461_p0)  }
 0x133   : > { %865 = vmatmul.mubr.msk.bf16.vlgmr.msra.gmra.mrb[0].mxu0 %vm436_vm0, %v470_v27  ;;  %v553_v51 = vrot.slane (%p461_p0), %v544_v50, %v552_v46  ;;  %v549_v52 = vrot.slane (%p461_p0), %v544_v50, %v548_v47  ;;  %769 = vrot.lane.b32.xlu1 (%p461_p0), %v766_v1, %s1157_s3  ;;  %v866_v3 = vld [vmem:[%s1467_s6] ss:$0 sm:$0xff] (%p461_p0)  ;;  %s1158_s6 = smov (%p461_p0), 127   ;;  %p1115_p4 = por (%p461_p0), %p1114_p3, %p1113_p2 }
 0x134   :  { %967 = vmatpush3.bf16.msra.mxu0 (%p461_p0), %v1089_v35 }
 0x135   :  { %968 = vmatprep.subr.bf16.mxu0 (%p461_p0), %v1090_v36  ;;  %p1116_p5 = pnand (%p461_p0), %p1115_p4, %p1109_p1 }
 0x138   :  { %969 = vmatpush3.bf16.msra.mxu0 (%p461_p0), %v1091_v37 }
 0x139   :  { %970 = vmatprep.subr.bf16.mxu0 (%p461_p0), %v1092_v38 }
 0x13c   :  { %971 = vmatpush3.bf16.msra.mxu0 (%p461_p0), %v1093_v40 }
 0x13d   :  { %972 = vmatprep.subr.bf16.mxu0 (%p461_p0), %v1094_v42 }
 0x140   :  { %973 = vmatpush3.bf16.msra.mxu0 (%p461_p0), %v1095_v44 }
 0x141   :  { %974 = vmatprep.subr.bf16.mxu0 (%p461_p0), %v1096_v45 }
 0x144   :  { %975 = vmatpush3.bf16.msra.mxu0 (%p461_p0), %v1097_v48 }
 0x145   :  { %976 = vmatprep.subr.bf16.mxu0 (%p461_p0), %v1098_v49 }
 0x148   :  { %977 = vmatpush3.bf16.msra.mxu0 (%p461_p0), %v1099_v53 }
 0x149   :  { %978 = vmatprep.subr.bf16.mxu0 (%p461_p0), %v1100_v55 }
 0x14c   :  { %979 = vmatpush3.bf16.msra.mxu0 (%p461_p0), %v1101_v58 }
 0x14d   :  { %980 = vmatprep.subr.bf16.mxu0 (%p461_p0), %v1102_v60 }
 0x150   :  { %981 = vmatpush3.bf16.msra.mxu0 (%p461_p0), %v1103_v62 }
 0x1a5   :  { %v770_v14 = vpop.permute.xlu1 (%p461_p0), %769 }
 0x204   :  { %463 = sbr.rel (!%p461_p0) target bundleno = 296 (0x128), region = 81 }
 0x206   : > { %v535_v28 = vpop.f32.mrb[0].mxu0 }
 0x207   : > { %v542_v29 = vadd.f32 %v1150_v21, %v535_v28   ;;  %v537_v30 = vpop.f32.mrb[1].mxu0 }
 0x208   : > { %v543_v31 = vadd.f32 %v1146_v20, %v537_v30   ;;  %v539_v32 = vpop.f32.mrb[2].mxu0 }
 0x209   : > { %v540_v33 = vpop.f32.mrb[3].mxu0  ;;  %v1149_v21 = vmov %v542_v29   ;;  %v556_v57 = vadd.f32 (%p461_p0), %v549_v52, %v542_v29 }
 0x20a   : > { %v1145_v20 = vmov %v543_v31   ;;  %v557_v54 = vadd.f32 (%p461_p0), %v553_v51, %v543_v31 }
 0x20b   :  { %v558_v61 = vmax.f32 %v556_v57, 0.0 }
 0x20c   :  { %v559_v56 = vmax.f32 %v557_v54, 0.0 }
 0x20d   :  { %v560_v63 = vpack.c.bf16 %v558_v61, %v558_v61 }
 0x20e   :  { %v561_v59 = vpack.c.bf16 %v559_v56, %v559_v56 }
 0x210   :  { %729 = vmatprep.mubr.bf16.mxu0 %v561_v59 }
 0x211   :  { %730 = vmatmul.mubr.bf16.vlgmr.msra.gmra.mrb[0].mxu0 %v560_v63 }
 0x2e4   :  { %v982_v2 = vpop.f32.mrb[0].mxu0 }
 0x2e5   :  { %v983_v4 = vpop.f32.mrb[1].mxu0 }
 0x2e6   :  { %v984_v5 = vadd.f32 %v983_v4, %v982_v2  ;;  %v985_v6 = vpop.f32.mrb[2].mxu0 }
 0x2e7   :  { %v986_v7 = vpop.f32.mrb[3].mxu0 }
 0x2e8   :  { %v732_v8 = vadd.f32 %v984_v5, %v866_v3 }
 0x2ea   :  { %v746_v9 = vsel %vm745_vm2, %v732_v8, -inf  ;;  %738 = vst.msk [vmem:[%s1468_s7] sm:$0x3] %vm737_vm3, %v732_v8 }
 0x2eb   :  { %747 = vmax.xlane.f32.xlu0 %v746_v9 }
 0x378   :  { %v748_v10 = vpop.xlane.xlu0 %747 }
 0x379   :  { %v749_v11 = vsub.f32 %v732_v8, %v748_v10  ;;  %vm767_vm4 = vcmp.eq.f32.partialorder %v732_v8, %v748_v10 }
 0x37a   :  { %v772_v15 = vsel %vm767_vm4, %v770_v14, 6.0 }
 0x37b   :  { %v750_v12 = vmul.f32 1.442695, %v749_v11  ;;  %v773_v16 = vsel %vm745_vm2, %v772_v15, inf }
 0x37d   :  { %1104 = vpow2.f32 %v750_v12 }
 0x387   :  { %v1105_v13 = vpop.eup %1104 }
 0x388   :  { %753 = vrot.lane.b32.xlu0 %v1105_v13, %s1158_s6 }
 0x3a7   :  { %774 = vmin.xlane.f32.xlu0 %v773_v16 }
 0x3fa   :  { %v754_v17 = vpop.permute.xlu0 %753 }
 0x3fb   :  { %v756_v18 = vsel %vm743_vm5, %v754_v17, 0.0 }
 0x3fc   :  { %757 = vadd.xlane.f32.xlu1 %v756_v18 }
 0x40d   :  { %740 = vrot.lane.b32.xlu1 %v732_v8, %s1158_s6 }
 0x434   :  { %v775_v19 = vpop.xlane.xlu0 %774 }
 0x435   :  { %v1004_v20 = vtrunc.f32 %v775_v19 }
 0x437   :  { %v1005_v21 = vcvt.f32.s32 %v1004_v20 }
 0x439   :  { %777 = vst.msk [vmem:[%s1470_s9] sm:$0x3] %vm737_vm3, %v1005_v21 }
 0x489   :  { %v758_v22 = vpop.xlane.xlu1 %757 }
 0x48a   :  { %1106 = vlog2.f32 %v758_v22 }
 0x48d   :  { %v741_v41 = vpop.permute.xlu1 %740 }
 0x48e   :  { %744 = vst.msk [vmem:[#allocation3] sm:$0x3] %vm743_vm5, %v741_v41 }
 0x48f   :  { %1119 = shalt.err (!%p1116_p5)
}
 0x490   :  { %s1120_s27 = scalar_lea.hbm %s1469_s8, 32 }
 0x491   :  { %p1121_p6 = scmp.ne.s32.totalorder %s1469_s8, %s1120_s27  ;;  %p1124_p7 = scmp.lt.u32.totalorder %s1120_s27, %s1469_s8 }
 0x493   :  { %p1126_p8 = pnand %p1124_p7, %p1121_p6 }
 0x495   :  { %1129 = shalt.err (!%p1126_p8)
}
 0x496   :  { %789 = dma.vmem_to_hbm [thread:$0]  %s787_s25, 32, %s1469_s8, [#allocation4]   ;;  %v1107_v23 = vpop.eup %1106 }
 0x497   :  { %v760_v24 = vmul.f32 0.6931472, %v1107_v23 }
 0x499   :  { %v761_v25 = vadd.f32 %v760_v24, %v748_v10 }
 0x49b   :  { %v762_v26 = vsub.f32 %v748_v10, %v761_v25 }
 0x49d   :  { %763 = vst.msk [vmem:[%s1471_s10] sm:$0x3] %vm737_vm3, %v762_v26 }
 0x49e   :  { %1142 = dma.done.wait [#allocation4], 32  }
 0x49f   :  { %1143 = vsyncadd [#allocation4], 4294967264 }
 0x4a0   :  { %803 = vsyncpa [#allocation4], 1 }

</bundles_post_ra>
